<compile_context>
chip_gen: v6e
topology: v6e:2x2x1
jax: 0.10.0
libtpu: 0.0.40
codegen_flags: <defaults>
</compile_context>

<pallas_src>
import functools

import jax
import jax.numpy as jnp
from jax import lax
from jax.experimental import pallas as pl
from jax.experimental.pallas import tpu as pltpu


def mv2_kernel(x_ref, w1_ref, b1_ref, wdw_ref, b2_ref, w2_ref, b3_ref, o_ref,
               *, H, W, hidden, use_res):
    """Fused MV2 block on a lane-dense slab.

    x_ref   : (R, W*Cin)        R = images_per_step * H
    w1_ref  : (W*Cin, W*hidden)  block-diagonal 1x1 expand conv (BN scale folded)
    wdw_ref : (9, W*hidden)      depthwise taps, BN scale + column masks folded
    w2_ref  : (W*hidden, W*Cout) block-diagonal 1x1 project conv (BN scale folded)
    b*_ref  : (1, lanes)         folded BN biases
    o_ref   : (R, W*Cout)
    """
    R = x_ref.shape[0]
    L = W * hidden

    x = x_ref[...]                                             # (R, W*Cin), f32

    # ---- 1x1 expand conv (block-diag MXU matmul) + BN bias + SiLU ----------
    h = jnp.dot(x, w1_ref[...], preferred_element_type=jnp.float32)
    h = h + b1_ref[...]
    h = h * jax.nn.sigmoid(h)                                  # SiLU

    # ---- 3x3 depthwise conv, stride 1, pad 1, via rolls + masks ------------
    # Row index *inside* each image: forbids taps crossing the top/bottom edge
    # (this also handles image boundaries inside a multi-image block, since
    # each image occupies exactly H consecutive rows).
    ri = lax.broadcasted_iota(jnp.int32, (R, 1), 0) % H
    can_up = ri > 0                                            # row r-1 exists
    can_dn = ri < (H - 1)                                      # row r+1 exists

    h_up = jnp.where(can_up, pltpu.roll(h, 1, axis=0), 0.0)     # value at row r-1
    h_dn = jnp.where(can_dn, pltpu.roll(h, R - 1, axis=0), 0.0)  # value at row r+1

    acc = jnp.zeros((R, L), jnp.float32)
    for di, h_row in ((-1, h_up), (0, h), (1, h_dn)):
        left = pltpu.roll(h_row, hidden, axis=1)               # value at col j-1
        right = pltpu.roll(h_row, L - hidden, axis=1)          # value at col j+1
        for dj, h_tap in ((-1, left), (0, h_row), (1, right)):
            t = (di + 1) * 3 + (dj + 1)
            # Column-edge masks and BN scale are already folded into wdw_ref.
            acc = acc + h_tap * wdw_ref[t:t + 1, :]
    acc = acc + b2_ref[...]
    acc = acc * jax.nn.sigmoid(acc)                            # SiLU

    # ---- 1x1 project conv (block-diag MXU matmul) + BN bias ----------------
    y = jnp.dot(acc, w2_ref[...], preferred_element_type=jnp.float32)
    y = y + b3_ref[...]

    if use_res:                                                # stride==1, inp==oup
        y = y + x

    o_ref[...] = y.astype(o_ref.dtype)


def _block_diag(w, reps):
    """(cin, cout) -> (reps*cin, reps*cout) block-diagonal weight."""
    cin, cout = w.shape
    eye = jnp.eye(reps, dtype=w.dtype)
    return jnp.einsum('pq,io->piqo', eye, w).reshape(reps * cin, reps * cout)


def mv2block_forward(x_nhwc, params, *, stride=1, images_per_step=None):
    """x_nhwc: (N, H, W, Cin) float32. Returns (N, H, W, Cout)."""
    assert stride == 1  # TODO(synk): stride=2 / expansion==1 variants.
    w1, s1, b1, wdw, s2, b2, w2, s3, b3 = params
    N, H, W, Cin = x_nhwc.shape
    hidden = w1.shape[1]
    Cout = w2.shape[1]
    use_res = (stride == 1 and Cin == Cout)

    # ---- choose images per grid step ---------------------------------------
    if images_per_step is None:
        per_image = H * W * (Cin + 4 * hidden + Cout) * 4      # rough f32 bytes
        budget = 8 * 1024 * 1024
        images_per_step = N                                    # fallback: 1 step
        for bn in range(1, N + 1):
            if N % bn:
                continue
            if bn != N and (bn * H) % 8:                       # (8,128) sublane rule
                continue
            if N >= 2 and N // bn < 2:                         # keep >=2 steps (v7x TCs)
                continue
            if bn * per_image > budget:
                continue
            images_per_step = bn
    Bn = images_per_step
    assert N % Bn == 0

    # ---- build lane-dense ("slab") operands in the wrapper ------------------
    f32 = jnp.float32
    s1f, b1f = s1.reshape(-1).astype(f32), b1.reshape(-1).astype(f32)
    s2f, b2f = s2.reshape(-1).astype(f32), b2.reshape(-1).astype(f32)
    s3f, b3f = s3.reshape(-1).astype(f32), b3.reshape(-1).astype(f32)

    # 1x1 convs as block-diagonal matmuls with the BN scale folded in.
    w1_bd = _block_diag(w1.astype(f32) * s1f[None, :], W)       # (W*Cin, W*hidden)
    w2_bd = _block_diag(w2.astype(f32) * s3f[None, :], W)       # (W*hidden, W*Cout)
    b1_slab = jnp.tile(b1f, (W,)).reshape(1, W * hidden)
    b2_slab = jnp.tile(b2f, (W,)).reshape(1, W * hidden)
    b3_slab = jnp.tile(b3f, (W,)).reshape(1, W * Cout)

    # Depthwise weights: fold BN scale and the column-boundary masks per tap.
    col = jnp.arange(W * hidden) // hidden                      # output column j
    taps = []
    for di in (-1, 0, 1):
        for dj in (-1, 0, 1):
            t = (di + 1) * 3 + (dj + 1)
            w_row = jnp.tile(wdw[t].astype(f32) * s2f, (W,))    # (W*hidden,)
            valid = (col + dj >= 0) & (col + dj <= W - 1)
            taps.append(jnp.where(valid, w_row, 0.0))
    wdw_slab = jnp.stack(taps)                                  # (9, W*hidden)

    # Lane-dense input / output slabs (wrapper-side reshapes are free).
    x_slab = x_nhwc.reshape(N * H, W * Cin)

    kernel = functools.partial(mv2_kernel, H=H, W=W, hidden=hidden,
                               use_res=use_res)
    R = Bn * H

    grid_spec = pltpu.PrefetchScalarGridSpec(
        num_scalar_prefetch=0,
        grid=(N // Bn,),
        in_specs=[
            pl.BlockSpec((R, W * Cin), lambda n: (n, 0)),
            pl.BlockSpec((W * Cin, W * hidden), lambda n: (0, 0)),
            pl.BlockSpec((1, W * hidden), lambda n: (0, 0)),
            pl.BlockSpec((9, W * hidden), lambda n: (0, 0)),
            pl.BlockSpec((1, W * hidden), lambda n: (0, 0)),
            pl.BlockSpec((W * hidden, W * Cout), lambda n: (0, 0)),
            pl.BlockSpec((1, W * Cout), lambda n: (0, 0)),
        ],
        out_specs=pl.BlockSpec((R, W * Cout), lambda n: (n, 0)),
    )

    out_slab = pl.pallas_call(
        kernel,
        out_shape=jax.ShapeDtypeStruct((N * H, W * Cout), x_nhwc.dtype),
        grid_spec=grid_spec,
        compiler_params=pltpu.CompilerParams(
            dimension_semantics=("parallel",),
            vmem_limit_bytes=32 * 1024 * 1024),
    )(x_slab, w1_bd, b1_slab, wdw_slab, b2_slab, w2_bd, b3_slab)

    return out_slab.reshape(N, H, W, Cout)


def mv2block_reference(x_nhwc, params):
    """Plain-JAX reference (inference-mode BN, unfolded)."""
    w1, s1, b1, wdw, s2, b2, w2, s3, b3 = params
    hidden = w1.shape[1]
    h = jnp.einsum('nhwc,cd->nhwd', x_nhwc, w1)
    h = h * s1.reshape(-1) + b1.reshape(-1)
    h = h * jax.nn.sigmoid(h)
    dw_w = wdw.reshape(3, 3, 1, hidden)                         # HWIO, depthwise
    h = lax.conv_general_dilated(
        h, dw_w, window_strides=(1, 1), padding=((1, 1), (1, 1)),
        dimension_numbers=('NHWC', 'HWIO', 'NHWC'),
        feature_group_count=hidden)
    h = h * s2.reshape(-1) + b2.reshape(-1)
    h = h * jax.nn.sigmoid(h)
    y = jnp.einsum('nhwd,do->nhwo', h, w2)
    y = y * s3.reshape(-1) + b3.reshape(-1)
    return x_nhwc + y                                           # use_res_connect path


def make_params(key, inp, oup, expansion=4):
    hidden = int(inp * expansion)
    ks = jax.random.split(key, 8)

    def bn_fold(k, c):
        k1, k2, k3, k4 = jax.random.split(k, 4)
        gamma = 1.0 + 0.1 * jax.random.normal(k1, (c,), jnp.float32)
        beta = 0.1 * jax.random.normal(k2, (c,), jnp.float32)
        mean = 0.1 * jax.random.normal(k3, (c,), jnp.float32)
        var = 1.0 + 0.1 * jax.random.uniform(k4, (c,), jnp.float32)
        eps = 1e-5
        scale = gamma / jnp.sqrt(var + eps)
        bias = beta - mean * scale
        return scale.reshape(1, c), bias.reshape(1, c)

    w1 = jax.random.normal(ks[0], (inp, hidden), jnp.float32) / jnp.sqrt(inp)
    wdw = jax.random.normal(ks[1], (9, hidden), jnp.float32) / 3.0
    w2 = jax.random.normal(ks[2], (hidden, oup), jnp.float32) / jnp.sqrt(hidden)
    s1, b1 = bn_fold(ks[3], hidden)
    s2, b2 = bn_fold(ks[4], hidden)
    s3, b3 = bn_fold(ks[5], oup)
    return (w1, s1, b1, wdw, s2, b2, w2, s3, b3)


if __name__ == "__main__":
    key = jax.random.PRNGKey(0)
    k_x, k_p = jax.random.split(key)

    N, Cin, H, W = 2, 8, 16, 16                     # inp == oup, stride 1 -> residual
    Cout, expansion = 8, 4

    x_nchw = jax.random.normal(k_x, (N, Cin, H, W), jnp.float32)  # PyTorch layout
    x_nhwc = jnp.transpose(x_nchw, (0, 2, 3, 1))                  # kernel layout

    params = make_params(k_p, Cin, Cout, expansion)

    out = mv2block_forward(x_nhwc, params, stride=1)
    out = jax.block_until_ready(out)

    ref = mv2block_reference(x_nhwc, params)
    assert out.shape == (N, H, W, Cout)
    assert jnp.allclose(out, ref, rtol=1e-3, atol=1e-3), "mismatch vs JAX reference"

    print("KERNEL_OK")
</pallas_src>

<mosaic_0001>
module attributes {stable_mosaic.version = 11 : i64} {
  func.func @mv2_kernel(%arg0: i32, %arg1: memref<16x128xf32, #tpu.memory_space<vmem>>, %arg2: memref<128x512xf32, #tpu.memory_space<vmem>>, %arg3: memref<1x512xf32, #tpu.memory_space<vmem>>, %arg4: memref<9x512xf32, #tpu.memory_space<vmem>>, %arg5: memref<1x512xf32, #tpu.memory_space<vmem>>, %arg6: memref<512x128xf32, #tpu.memory_space<vmem>>, %arg7: memref<1x128xf32, #tpu.memory_space<vmem>>, %arg8: memref<16x128xf32, #tpu.memory_space<vmem>>) attributes {dimension_semantics = [#tpu.dimension_semantics<parallel>], iteration_bounds = array<i64: 2>, scalar_prefetch = 0 : i64, scratch_operands = 0 : i64, tpu.core_type = #tpu.core_type<tc>, window_params = [{transform_indices = @transform_0, window_bounds = array<i64: 16, 128>}, {pipeline_mode = #tpu.pipeline_mode<synchronous>, transform_indices = @transform_1, window_bounds = array<i64: 128, 512>}, {pipeline_mode = #tpu.pipeline_mode<synchronous>, transform_indices = @transform_2, window_bounds = array<i64: 1, 512>}, {pipeline_mode = #tpu.pipeline_mode<synchronous>, transform_indices = @transform_3, window_bounds = array<i64: 9, 512>}, {pipeline_mode = #tpu.pipeline_mode<synchronous>, transform_indices = @transform_4, window_bounds = array<i64: 1, 512>}, {pipeline_mode = #tpu.pipeline_mode<synchronous>, transform_indices = @transform_5, window_bounds = array<i64: 512, 128>}, {pipeline_mode = #tpu.pipeline_mode<synchronous>, transform_indices = @transform_6, window_bounds = array<i64: 1, 128>}, {transform_indices = @transform_7, window_bounds = array<i64: 16, 128>}]} {
    %c0 = arith.constant 0 : index
    %c0_0 = arith.constant 0 : index
    %0 = vector.load %arg1[%c0, %c0_0] : memref<16x128xf32, #tpu.memory_space<vmem>>, vector<16x128xf32>
    %c0_1 = arith.constant 0 : index
    %c0_2 = arith.constant 0 : index
    %1 = vector.load %arg2[%c0_1, %c0_2] : memref<128x512xf32, #tpu.memory_space<vmem>>, vector<128x512xf32>
    %cst = arith.constant dense<0.000000e+00> : vector<16x512xf32>
    %2 = tpu.matmul %0, %1, %cst {dimension_numbers = #tpu.dot_dimension_numbers<[1], [0], [0], [1], [0, 0, 1, 1], [], []>} : vector<16x128xf32>, vector<128x512xf32>, vector<16x512xf32> -> vector<16x512xf32>
    %c0_3 = arith.constant 0 : index
    %c0_4 = arith.constant 0 : index
    %3 = vector.load %arg3[%c0_3, %c0_4] : memref<1x512xf32, #tpu.memory_space<vmem>>, vector<1x512xf32>
    %4 = vector.broadcast %3 : vector<1x512xf32> to vector<16x512xf32>
    %5 = arith.addf %2, %4 : vector<16x512xf32>
    %6 = arith.negf %5 : vector<16x512xf32>
    %7 = math.exp %6 : vector<16x512xf32>
    %cst_5 = arith.constant 1.000000e+00 : f32
    %8 = vector.broadcast %cst_5 : f32 to vector<16x512xf32>
    %9 = arith.addf %8, %7 : vector<16x512xf32>
    %10 = arith.divf %8, %9 : vector<16x512xf32>
    %11 = arith.mulf %5, %10 : vector<16x512xf32>
    %12 = tpu.iota {dimensions = array<i32: 0>} : vector<16x1xi32>
    %c16_i32 = arith.constant 16 : i32
    %c0_i32 = arith.constant 0 : i32
    %13 = arith.cmpi eq, %c16_i32, %c0_i32 : i32
    %c1_i32 = arith.constant 1 : i32
    %14 = arith.select %13, %c1_i32, %c16_i32 : i32
    %15 = vector.broadcast %14 : i32 to vector<16x1xi32>
    %16 = arith.remsi %12, %15 : vector<16x1xi32>
    %c0_i32_6 = arith.constant 0 : i32
    %17 = vector.broadcast %c0_i32_6 : i32 to vector<16x1xi32>
    %18 = arith.cmpi ne, %16, %17 : vector<16x1xi32>
    %c0_i32_7 = arith.constant 0 : i32
    %19 = vector.broadcast %c0_i32_7 : i32 to vector<16x1xi32>
    %20 = arith.cmpi slt, %16, %19 : vector<16x1xi32>
    %c0_i32_8 = arith.constant 0 : i32
    %21 = arith.cmpi slt, %14, %c0_i32_8 : i32
    %22 = vector.broadcast %21 : i1 to vector<16x1xi1>
    %23 = vector.broadcast %22 : vector<16x1xi1> to vector<16x1xi1>
    %24 = arith.xori %20, %23 : vector<16x1xi1>
    %25 = arith.andi %24, %18 : vector<16x1xi1>
    %26 = vector.broadcast %14 : i32 to vector<16x1xi32>
    %27 = arith.addi %16, %26 : vector<16x1xi32>
    %28 = arith.select %25, %27, %16 : vector<16x1xi1>, vector<16x1xi32>
    %c0_i32_9 = arith.constant 0 : i32
    %29 = vector.broadcast %c0_i32_9 : i32 to vector<16x1xi32>
    %30 = arith.cmpi sgt, %28, %29 : vector<16x1xi32>
    %c15_i32 = arith.constant 15 : i32
    %31 = vector.broadcast %c15_i32 : i32 to vector<16x1xi32>
    %32 = arith.cmpi slt, %28, %31 : vector<16x1xi32>
    %c1_i32_10 = arith.constant 1 : i32
    %33 = tpu.dynamic_rotate %11 by %c1_i32_10 dim 0 : vector<16x512xf32>, i32 -> vector<16x512xf32>
    %cst_11 = arith.constant 0.000000e+00 : f32
    %34 = vector.shape_cast %30 : vector<16x1xi1> to vector<16x1xi1>
    %35 = vector.broadcast %34 : vector<16x1xi1> to vector<16x512xi1>
    %36 = vector.broadcast %cst_11 : f32 to vector<16x512xf32>
    %37 = arith.select %35, %33, %36 : vector<16x512xi1>, vector<16x512xf32>
    %c15_i32_12 = arith.constant 15 : i32
    %38 = tpu.dynamic_rotate %11 by %c15_i32_12 dim 0 : vector<16x512xf32>, i32 -> vector<16x512xf32>
    %cst_13 = arith.constant 0.000000e+00 : f32
    %39 = vector.shape_cast %32 : vector<16x1xi1> to vector<16x1xi1>
    %40 = vector.broadcast %39 : vector<16x1xi1> to vector<16x512xi1>
    %41 = vector.broadcast %cst_13 : f32 to vector<16x512xf32>
    %42 = arith.select %40, %38, %41 : vector<16x512xi1>, vector<16x512xf32>
    %cst_14 = arith.constant 0.000000e+00 : f32
    %43 = vector.broadcast %cst_14 : f32 to vector<16x512xf32>
    %c32_i32 = arith.constant 32 : i32
    %44 = tpu.dynamic_rotate %37 by %c32_i32 dim 1 : vector<16x512xf32>, i32 -> vector<16x512xf32>
    %c480_i32 = arith.constant 480 : i32
    %45 = tpu.dynamic_rotate %37 by %c480_i32 dim 1 : vector<16x512xf32>, i32 -> vector<16x512xf32>
    %c0_15 = arith.constant 0 : index
    %c0_16 = arith.constant 0 : index
    %46 = vector.load %arg4[%c0_15, %c0_16] : memref<9x512xf32, #tpu.memory_space<vmem>>, vector<1x512xf32>
    %47 = vector.broadcast %46 : vector<1x512xf32> to vector<16x512xf32>
    %48 = arith.mulf %44, %47 : vector<16x512xf32>
    %49 = arith.addf %43, %48 : vector<16x512xf32>
    %c1 = arith.constant 1 : index
    %c0_17 = arith.constant 0 : index
    %50 = vector.load %arg4[%c1, %c0_17] : memref<9x512xf32, #tpu.memory_space<vmem>>, vector<1x512xf32>
    %51 = vector.broadcast %50 : vector<1x512xf32> to vector<16x512xf32>
    %52 = arith.mulf %37, %51 : vector<16x512xf32>
    %53 = arith.addf %49, %52 : vector<16x512xf32>
    %c2 = arith.constant 2 : index
    %c0_18 = arith.constant 0 : index
    %54 = vector.load %arg4[%c2, %c0_18] : memref<9x512xf32, #tpu.memory_space<vmem>>, vector<1x512xf32>
    %55 = vector.broadcast %54 : vector<1x512xf32> to vector<16x512xf32>
    %56 = arith.mulf %45, %55 : vector<16x512xf32>
    %57 = arith.addf %53, %56 : vector<16x512xf32>
    %c32_i32_19 = arith.constant 32 : i32
    %58 = tpu.dynamic_rotate %11 by %c32_i32_19 dim 1 : vector<16x512xf32>, i32 -> vector<16x512xf32>
    %c480_i32_20 = arith.constant 480 : i32
    %59 = tpu.dynamic_rotate %11 by %c480_i32_20 dim 1 : vector<16x512xf32>, i32 -> vector<16x512xf32>
    %c3 = arith.constant 3 : index
    %c0_21 = arith.constant 0 : index
    %60 = vector.load %arg4[%c3, %c0_21] : memref<9x512xf32, #tpu.memory_space<vmem>>, vector<1x512xf32>
    %61 = vector.broadcast %60 : vector<1x512xf32> to vector<16x512xf32>
    %62 = arith.mulf %58, %61 : vector<16x512xf32>
    %63 = arith.addf %57, %62 : vector<16x512xf32>
    %c4 = arith.constant 4 : index
    %c0_22 = arith.constant 0 : index
    %64 = vector.load %arg4[%c4, %c0_22] : memref<9x512xf32, #tpu.memory_space<vmem>>, vector<1x512xf32>
    %65 = vector.broadcast %64 : vector<1x512xf32> to vector<16x512xf32>
    %66 = arith.mulf %11, %65 : vector<16x512xf32>
    %67 = arith.addf %63, %66 : vector<16x512xf32>
    %c5 = arith.constant 5 : index
    %c0_23 = arith.constant 0 : index
    %68 = vector.load %arg4[%c5, %c0_23] : memref<9x512xf32, #tpu.memory_space<vmem>>, vector<1x512xf32>
    %69 = vector.broadcast %68 : vector<1x512xf32> to vector<16x512xf32>
    %70 = arith.mulf %59, %69 : vector<16x512xf32>
    %71 = arith.addf %67, %70 : vector<16x512xf32>
    %c32_i32_24 = arith.constant 32 : i32
    %72 = tpu.dynamic_rotate %42 by %c32_i32_24 dim 1 : vector<16x512xf32>, i32 -> vector<16x512xf32>
    %c480_i32_25 = arith.constant 480 : i32
    %73 = tpu.dynamic_rotate %42 by %c480_i32_25 dim 1 : vector<16x512xf32>, i32 -> vector<16x512xf32>
    %c6 = arith.constant 6 : index
    %c0_26 = arith.constant 0 : index
    %74 = vector.load %arg4[%c6, %c0_26] : memref<9x512xf32, #tpu.memory_space<vmem>>, vector<1x512xf32>
    %75 = vector.broadcast %74 : vector<1x512xf32> to vector<16x512xf32>
    %76 = arith.mulf %72, %75 : vector<16x512xf32>
    %77 = arith.addf %71, %76 : vector<16x512xf32>
    %c7 = arith.constant 7 : index
    %c0_27 = arith.constant 0 : index
    %78 = vector.load %arg4[%c7, %c0_27] : memref<9x512xf32, #tpu.memory_space<vmem>>, vector<1x512xf32>
    %79 = vector.broadcast %78 : vector<1x512xf32> to vector<16x512xf32>
    %80 = arith.mulf %42, %79 : vector<16x512xf32>
    %81 = arith.addf %77, %80 : vector<16x512xf32>
    %c8 = arith.constant 8 : index
    %c0_28 = arith.constant 0 : index
    %82 = vector.load %arg4[%c8, %c0_28] : memref<9x512xf32, #tpu.memory_space<vmem>>, vector<1x512xf32>
    %83 = vector.broadcast %82 : vector<1x512xf32> to vector<16x512xf32>
    %84 = arith.mulf %73, %83 : vector<16x512xf32>
    %85 = arith.addf %81, %84 : vector<16x512xf32>
    %c0_29 = arith.constant 0 : index
    %c0_30 = arith.constant 0 : index
    %86 = vector.load %arg5[%c0_29, %c0_30] : memref<1x512xf32, #tpu.memory_space<vmem>>, vector<1x512xf32>
    %87 = vector.broadcast %86 : vector<1x512xf32> to vector<16x512xf32>
    %88 = arith.addf %85, %87 : vector<16x512xf32>
    %89 = arith.negf %88 : vector<16x512xf32>
    %90 = math.exp %89 : vector<16x512xf32>
    %cst_31 = arith.constant 1.000000e+00 : f32
    %91 = vector.broadcast %cst_31 : f32 to vector<16x512xf32>
    %92 = arith.addf %91, %90 : vector<16x512xf32>
    %93 = arith.divf %91, %92 : vector<16x512xf32>
    %94 = arith.mulf %88, %93 : vector<16x512xf32>
    %c0_32 = arith.constant 0 : index
    %c0_33 = arith.constant 0 : index
    %95 = vector.load %arg6[%c0_32, %c0_33] : memref<512x128xf32, #tpu.memory_space<vmem>>, vector<512x128xf32>
    %cst_34 = arith.constant dense<0.000000e+00> : vector<16x128xf32>
    %96 = tpu.matmul %94, %95, %cst_34 {dimension_numbers = #tpu.dot_dimension_numbers<[1], [0], [0], [1], [0, 0, 1, 1], [], []>} : vector<16x512xf32>, vector<512x128xf32>, vector<16x128xf32> -> vector<16x128xf32>
    %c0_35 = arith.constant 0 : index
    %c0_36 = arith.constant 0 : index
    %97 = vector.load %arg7[%c0_35, %c0_36] : memref<1x128xf32, #tpu.memory_space<vmem>>, vector<1x128xf32>
    %98 = vector.broadcast %97 : vector<1x128xf32> to vector<16x128xf32>
    %99 = arith.addf %96, %98 : vector<16x128xf32>
    %100 = arith.addf %99, %0 : vector<16x128xf32>
    %c0_37 = arith.constant 0 : index
    %c0_38 = arith.constant 0 : index
    %101 = vector.load %arg8[%c0_37, %c0_38] : memref<16x128xf32, #tpu.memory_space<vmem>>, vector<16x128xf32>
    tpu.vector_store %arg8[%c0_37, %c0_38], %100 {strides = array<i32>} : memref<16x128xf32, #tpu.memory_space<vmem>>, vector<16x128xf32>,
    return
  }
  func.func @transform_0(%arg0: i32) -> (i32, i32) {
    %c0_i32 = arith.constant 0 : i32
    %c0_i32_0 = arith.constant 0 : i32
    return %arg0, %c0_i32 : i32, i32
  }
  func.func @transform_1(%arg0: i32) -> (i32, i32) {
    %c0_i32 = arith.constant 0 : i32
    %c0_i32_0 = arith.constant 0 : i32
    %c0_i32_1 = arith.constant 0 : i32
    return %c0_i32, %c0_i32_0 : i32, i32
  }
  func.func @transform_2(%arg0: i32) -> (i32, i32) {
    %c0_i32 = arith.constant 0 : i32
    %c0_i32_0 = arith.constant 0 : i32
    %c0_i32_1 = arith.constant 0 : i32
    return %c0_i32, %c0_i32_0 : i32, i32
  }
  func.func @transform_3(%arg0: i32) -> (i32, i32) {
    %c0_i32 = arith.constant 0 : i32
    %c0_i32_0 = arith.constant 0 : i32
    %c0_i32_1 = arith.constant 0 : i32
    return %c0_i32, %c0_i32_0 : i32, i32
  }
  func.func @transform_4(%arg0: i32) -> (i32, i32) {
    %c0_i32 = arith.constant 0 : i32
    %c0_i32_0 = arith.constant 0 : i32
    %c0_i32_1 = arith.constant 0 : i32
    return %c0_i32, %c0_i32_0 : i32, i32
  }
  func.func @transform_5(%arg0: i32) -> (i32, i32) {
    %c0_i32 = arith.constant 0 : i32
    %c0_i32_0 = arith.constant 0 : i32
    %c0_i32_1 = arith.constant 0 : i32
    return %c0_i32, %c0_i32_0 : i32, i32
  }
  func.func @transform_6(%arg0: i32) -> (i32, i32) {
    %c0_i32 = arith.constant 0 : i32
    %c0_i32_0 = arith.constant 0 : i32
    %c0_i32_1 = arith.constant 0 : i32
    return %c0_i32, %c0_i32_0 : i32, i32
  }
  func.func @transform_7(%arg0: i32) -> (i32, i32) {
    %c0_i32 = arith.constant 0 : i32
    %c0_i32_0 = arith.constant 0 : i32
    return %arg0, %c0_i32 : i32, i32
  }
}

</mosaic_0001>

<bundles_post_ra>
// kernel: tpu_custom_call.1
= control target key start
LH: loop header
LB: loop body
LE: loop exit
PB: predicated region body
PF: predicated region fallthrough
CT: control target
= control target key end

     0   :  { %s3169_s0 = inlined_call_operand.hbm [shape: f32[32,128], index: 0, kind: input, shape index: {}]   ;;  %s3170_s1 = inlined_call_operand.hbm [shape: f32[128,512], index: 1, kind: input, shape index: {}]   ;;  %s3171_s2 = inlined_call_operand.hbm [shape: f32[1,512], index: 2, kind: input, shape index: {}]   ;;  %s3172_s3 = inlined_call_operand.hbm [shape: f32[9,512], index: 3, kind: input, shape index: {}]   ;;  %s3173_s4 = inlined_call_operand.vmem [shape: f32[1,512], index: 4, kind: input, shape index: {}]   ;;  %s3174_s5 = inlined_call_operand.hbm [shape: f32[512,128], index: 5, kind: input, shape index: {}]   ;;  %s3175_s6 = inlined_call_operand.vmem [shape: f32[1,128], index: 6, kind: input, shape index: {}]   ;;  %s3176_s7 = inlined_call_operand.hbm [shape: f32[32,128], index: 7, kind: output, shape index: {}]  }
   0x1   :  { %3199 = sst [smem:[#allocation49_spill]] %s3170_s1 }
   0x2   :  { %12 = vsyncpa [#allocation3], 0 }
   0x3   :  { %14 = vsyncpa [#allocation3 + $0x1], 0 }
   0x4   :  { %15 = vsyncpa [#allocation6], 0 }
   0x5   :  { %16 = vsyncpa [#allocation9], 0 }
   0x6   :  { %17 = vsyncpa [#allocation4], 0 }
   0x7   :  { %19 = vsyncpa [#allocation4 + $0x1], 0  ;;  %s2216_s24 = smov 0   ;;  %s2218_s25 = smov 0  }
   0x8   :  { %s2220_s26 = smov 0   ;;  %s2222_s27 = smov 0  }
   0x9 LB: > { %s2237_s28 = sadd.s32 4294967295, %s2159_s27   ;;  %s1676_s29 = sadd.s32 4294967294, %s2159_s27   ;;  %s2159_s27 = sphi %s2222_s27, %s3292_s27   ;;  %s2155_s26 = sphi %s2220_s26, %s3291_s26   ;;  %s2151_s25 = sphi %s2218_s25, %s3290_s25   ;;  %s2147_s24 = sphi %s2216_s24, %s3289_s24  }
   0xa   : > { %p45_p0 = scmp.ne.s32.totalorder %s2151_s25, %s2147_s24  ;;  %p3177_p1 = scmp.eq.s32.totalorder %s2237_s28, 0 }
   0xb   : > { %p201_p3 = scmp.eq.s32.totalorder %s1676_s29, 1  ;;  %p1677_p5 = scmp.ge.s32.totalorder %s2159_s27, 1 }
   0xc   : > { %p2246_p4 = por %p3177_p1, %p45_p0  ;;  %p208_p7 = scmp.lt.s32.totalorder %s2159_s27, 3 }
   0xd   : > { %p2251_p6 = por %p201_p3, %p45_p0  ;;  %s2161_s10 = smov [#allocation5]  }
   0xe   : > { %s3200_s30 = scalar_select %p2246_p4, 1, 0 }
   0xf   : > { %s3201_s8 = scalar_select %p2251_p6, 1, 0 }
  0x10   : > { %p2256_p8 = pnand %p1677_p5, %p208_p7  ;;  %s220_s11 = sshll.u32 %s2161_s10, 4  ;;  %s221_s11 = int_to_ptr.vmem [resolvable:$true] %s220_s11 }
  0x11   : > { %s2162_s13 = smov [#allocation8]   ;;  %s2163_s15 = smov [#allocation7]  }
  0x12   : > { %s3202_s9 = scalar_select %p2256_p8, 1, 0 }
  0x13   : > { %p1813_p9 = pneg %p2256_p8  ;;  %s244_s14 = sshll.u32 %s2162_s13, 4  ;;  %s245_s14 = int_to_ptr.vmem [resolvable:$true] %s244_s14 }
  0x14   : > { %s234_s16 = sshll.u32 %s2163_s15, 4  ;;  %s1966_s17 = scalar_lea.vmem %s221_s11, 8192  ;;  %s235_s16 = int_to_ptr.vmem [resolvable:$true] %s234_s16 }
  0x15   : > { %p2265_p11 = pnand %p1813_p9, %p3177_p1  ;;  %p1967_p13 = scmp.ne.s32.totalorder %s221_s11, %s1966_s17 }
  0x16   : > { %p1974_p5 = scmp.lt.s32.totalorder %s221_s11, %s221_s11  ;;  %p1975_p7 = scmp.lt.s32.totalorder %s1966_s17, %s1966_s17 }
  0x17   : > { %p1957_p12 = pneg %p2265_p11 }
  0x18   : > { %p1976_p9 = por %p1975_p7, %p1974_p5 }
  0x19   : > { %p1969_p0 = pnand %p1967_p13, %p1957_p12 }
  0x1b   : > { %p1970_p3 = pneg %p1969_p0 }
  0x1d   : > { %p1977_p10 = pnand %p1976_p9, %p1970_p3 }
  0x1f   : > { %1980 = shalt.err (!%p1977_p10)
}
  0x20   : > { %s2164_s18 = smov 512   ;;  %s2165_s19 = smov 32  }
  0x21   : > { %s3204_s1 = sld [smem:[#allocation49_spill]]  ;;  %s1992_s22 = scalar_lea.vmem %s245_s14, 1024 }
  0x22   : > { %p1993_p1 = scmp.ne.s32.totalorder %s245_s14, %s1992_s22  ;;  %p2000_p2 = scmp.lt.s32.totalorder %s245_s14, %s245_s14 }
  0x23   : > { %p2001_p6 = scmp.lt.s32.totalorder %s1992_s22, %s1992_s22 }
  0x24   : > { %p1995_p13 = pnand %p1993_p1, %p1957_p12 }
  0x25   : > { %p2002_p5 = por %p2001_p6, %p2000_p2 }
  0x26   : > { %p1996_p0 = pneg %p1995_p13 }
  0x27   : > { %1816 = dma.hbm_to_vmem [thread:$0]  (!%p2265_p11), %s3204_s1, 8192, %s221_s11, [#allocation6], %s2164_s18, %s2164_s18, %s2165_s19  }
  0x28   : > { %p2003_p3 = pnand %p2002_p5, %p1996_p0 }
  0x2a   : > { %2006 = shalt.err (!%p2003_p3)
}
  0x2b   : > { %1822 = dma.hbm_to_vmem [thread:$0]  (!%p2265_p11), %s3172_s3, 1024, %s245_s14, [#allocation9], %s2164_s18, %s2164_s18, %s2165_s19  }
  0x2c   : > { %s2018_s10 = scalar_lea.vmem %s235_s16, 64  ;;  %p2026_p9 = scmp.lt.s32.totalorder %s235_s16, %s235_s16 }
  0x2d   : > { %p2019_p10 = scmp.ne.s32.totalorder %s235_s16, %s2018_s10  ;;  %p2027_p13 = scmp.lt.s32.totalorder %s2018_s10, %s2018_s10 }
  0x2f   : > { %p2021_p7 = pnand %p2019_p10, %p1957_p12  ;;  %p2028_p4 = por %p2027_p13, %p2026_p9 }
  0x31   : > { %p2022_p1 = pneg %p2021_p7 }
  0x33   : > { %p2029_p2 = pnand %p2028_p4, %p2022_p1 }
  0x35   : > { %2032 = shalt.err (!%p2029_p2)
}
  0x36   : > { %1819 = dma.hbm_to_vmem [thread:$0]  (!%p2265_p11), %s3171_s2, 64, %s235_s16, [#allocation6]  }
  0x37   : > { %s2166_s14 = smov [#allocation10]  }
  0x38   : > { %s260_s15 = sshll.u32 %s2166_s14, 4  ;;  %s261_s15 = int_to_ptr.vmem [resolvable:$true] %s260_s15 }
  0x39   : > { %s2044_s17 = scalar_lea.vmem %s261_s15, 8192  ;;  %p2052_p3 = scmp.lt.s32.totalorder %s261_s15, %s261_s15 }
  0x3a   : > { %p2045_p6 = scmp.ne.s32.totalorder %s261_s15, %s2044_s17  ;;  %p2053_p10 = scmp.lt.s32.totalorder %s2044_s17, %s2044_s17 }
  0x3c   : > { %p2047_p0 = pnand %p2045_p6, %p1957_p12  ;;  %p2054_p4 = por %p2053_p10, %p2052_p3 }
  0x3e   : > { %p2048_p5 = pneg %p2047_p0 }
  0x40   : > { %p2055_p7 = pnand %p2054_p4, %p2048_p5 }
  0x42   : > { %2058 = shalt.err (!%p2055_p7)
}
  0x43   : > { %s3179_s18 = smov 128   ;;  %s3180_s16 = smov 8  }
  0x44   : > { %1825 = dma.hbm_to_vmem [thread:$0]  (!%p2265_p11), %s3174_s5, 8192, %s261_s15, [#allocation9], %s3179_s18, %s3179_s18, %s3180_s16  }
  0x45   : > { %s2307_s21 = sadd.s32 1, %s2159_s27   ;;  %s32_s23 = sadd.s32 1, %s2155_s26 }
  0x46   : > { %s29_s22 = ssub.s32 %s2159_s27, %s2307_s21  ;;  %p39_p1 = scmp.ne.s32.totalorder %s2155_s26, %s2151_s25 }
  0x47   : > { %p30_p12 = scmp.eq.s32.totalorder %s29_s22, 0  ;;  %p40_p9 = scmp.eq.s32.totalorder %s2159_s27, 0 }
  0x48   : > { %p3205_p2 = scmp.eq.s32.totalorder %s2237_s28, 1  ;;  %p1838_p0 = scmp.lt.s32.totalorder %s2159_s27, 2 }
  0x49   : > { %s2316_s29 = scalar_select %p30_p12, %s2155_s26, %s32_s23  }
  0x4a   : > { %p41_p13 = por %p40_p9, %p39_p1  ;;  %p2320_p6 = por %p3205_p2, %p39_p1 }
  0x4b   : > { %s277_s10 = sand.u32 1, %s2155_s26   ;;  %s1715_s13 = sshll.u32 %s2159_s27, 8 }
  0x4c   : > { %s3206_s12 = scalar_select %p2320_p6, 1, 0 }
  0x4d   : > { %s1683_s11 = sshll.u32 %s277_s10, 4  ;;  %s2330_s17 = scalar_lea.hbm %s3169_s0, %s1715_s13 }
  0x4e   : > { %s281_s19 = scalar_lea.vmem [#allocation2], %s1683_s11  ;;  %p2334_p11 = pnand %p1838_p0, %p41_p13 }
  0x4f   : > { %s288_s20 = sshll.u32 %s281_s19, 4  ;;  %s2338_s23 = scalar_lea.sflag [#allocation3], %s277_s10  ;;  %s2332_s20 = int_to_ptr.vmem [resolvable:$true] %s288_s20 }
  0x50   : > { %s2059_s18 = scalar_lea.hbm %s2330_s17, 256  ;;  %p2061_p3 = pneg %p2334_p11 }
  0x51   : > { %p2060_p5 = scmp.ne.s32.totalorder %s2330_s17, %s2059_s18  ;;  %s2064_s11 = scalar_lea.hbm %s3169_s0, 512 }
  0x52   : > { %p2065_p7 = scmp.lt.s32.totalorder %s2330_s17, %s3169_s0  ;;  %p2066_p12 = scmp.lt.s32.totalorder %s2064_s11, %s2059_s18 }
  0x53   : > { %p2062_p10 = pnand %p2061_p3, %p2060_p5 }
  0x54   : > { %p2067_p1 = por %p2066_p12, %p2065_p7 }
  0x55   : > { %p2063_p4 = pneg %p2062_p10 }
  0x57   : > { %p2068_p9 = pnand %p2067_p1, %p2063_p4 }
  0x59   : > { %2071 = shalt.err (!%p2068_p9)
}
  0x5a   : > { %s2072_s10 = scalar_lea.vmem %s2332_s20, 256  ;;  %s2169_s16 = smov [#allocation2]  }
  0x5b   : > { %p2073_p13 = scmp.ne.s32.totalorder %s2332_s20, %s2072_s10  ;;  %s2077_s1 = sshll.u32 %s2169_s16, 4  ;;  %s2078_s1 = int_to_ptr.vmem [resolvable:$false] %s2077_s1 }
  0x5c   : > { %s2079_s13 = scalar_lea.vmem %s2078_s1, 512  ;;  %p2080_p5 = scmp.lt.s32.totalorder %s2332_s20, %s2078_s1 }
  0x5d   : > { %p2075_p2 = pnand %p2073_p13, %p2061_p3  ;;  %p2081_p10 = scmp.lt.s32.totalorder %s2079_s13, %s2072_s10 }
  0x5f   : > { %p2076_p0 = pneg %p2075_p2  ;;  %p2082_p6 = por %p2081_p10, %p2080_p5 }
  0x61   : > { %p2083_p8 = pnand %p2082_p6, %p2076_p0 }
  0x63   : > { %2086 = shalt.err (!%p2083_p8)
}
  0x64   : > { %s3208_s18 = smov 8   ;;  %s3209_s14 = smov 128  }
  0x65   : > { %1829 = dma.hbm_to_vmem [thread:$0]  (!%p2334_p11), %s2330_s17, 256, %s2332_s20, %s2338_s23, %s3209_s14, %s3209_s14, %s3208_s18  }
  0x66   : > { %p3210_p3 = scmp.ne.s32.totalorder %s3202_s9, 0 }
  0x68   : > { %300 = sbr.rel (%p3210_p3) target bundleno = 850 (0x352), region = 48 }
  0x6d   : > { %s2365_s16 = sand.u32 1, %s2151_s25   ;;  %p3211_p8 = scmp.ne.s32.totalorder %s3200_s30, 0 }
  0x6e   : > { %s1687_s1 = sshll.u32 %s2365_s16, 4  ;;  %s303_s11 = scalar_lea.sflag [#allocation3], %s2365_s16 }
  0x6f   : > { %s2371_s22 = scalar_lea.vmem [#allocation2], %s1687_s1 }
  0x70   : > { %2130 = dma.done.wait (%p3211_p8), %s303_s11, 256  }
  0x71   : > { %2132 = vsyncadd (%p3211_p8), %s303_s11, 4294967040  ;;  %p3212_p6 = scmp.eq.s32.totalorder %s2237_s28, 0 }
  0x73   : > { %2134 = dma.done.wait (%p3212_p6), [#allocation6], 8256   ;;  %p3213_p11 = pmov %p3212_p6 }
  0x74   : > { %p3214_p4 = pmov %p3212_p6 }
  0x75   : > { %2136 = vsyncadd (%p3213_p11), [#allocation6], 4294959040 }
  0x76   : > { %2138 = dma.done.wait (%p3214_p4), [#allocation9], 9216   ;;  %p3215_p7 = pmov %p3214_p4 }
  0x77   : > { %v2170_v0 = vmov 0.0   ;;  %v418_v1 = vld [vmem:[#allocation5 + $0x1e8] sm:$0xff]  ;;  %v420_v2 = vld [vmem:[#allocation5 + $0x1f8] sm:$0xff]  ;;  %v417_v3 = vld [vmem:[#allocation5 + $0x1e0] sm:$0xff]  ;;  %s2171_s30 = smov 32   ;;  %s2172_s9 = smov 96  }
  0x78   : > { %2140 = vsyncadd (%p3215_p7), [#allocation9], 4294958080  ;;  %507 = vmatprep.mubr.f32.mxu0 %v2170_v0  ;;  %584 = vmatprep.mubr.f32.mxu1 %v2170_v0  ;;  %v419_v4 = vld [vmem:[#allocation5 + $0x1f0] sm:$0xff]  ;;  %v414_v5 = vld [vmem:[#allocation5 + $0x1c8] sm:$0xff]  ;;  %s352_s19 = scalar_lea.vmem [#allocation11], %s1687_s1  ;;  %s1716_s13 = sshll.u32 %s2237_s28, 8 }
  0x79   : > { %443 = vmatprep.subr.mxu0 %v418_v1  ;;  %520 = vmatprep.subr.mxu1 %v420_v2  ;;  %v416_v6 = vld [vmem:[#allocation5 + $0x1d8] sm:$0xff]  ;;  %v413_v7 = vld [vmem:[#allocation5 + $0x1c0] sm:$0xff]  ;;  %v415_v8 = vld [vmem:[#allocation5 + $0x1d0] sm:$0xff]  ;;  %s1565_s10 = sshll.u32 %s352_s19, 4  ;;  %s3125_s11 = scalar_lea.hbm %s3176_s7, %s1716_s13  ;;  %s3120_s10 = int_to_ptr.vmem [resolvable:$true] %s1565_s10 }
  0x7a   : > { %444 = vmatpush1.msra.mxu0 %v417_v3  ;;  %521 = vmatpush1.msra.mxu1 %v419_v4  ;;  %v410_v9 = vld [vmem:[#allocation5 + $0x1a8] sm:$0xff]  ;;  %v412_v10 = vld [vmem:[#allocation5 + $0x1b8] sm:$0xff]  ;;  %v409_v11 = vld [vmem:[#allocation5 + $0x1a0] sm:$0xff]  ;;  %v423_v4 = vlaneseq  ;;  %s1552_s1 = scalar_lea.sflag [#allocation4], %s2365_s16  ;;  %p3286_p1 = scmp.ne.s32.totalorder %s3206_s12, 0 }
  0x7b   : > { %445 = vmatprep.subr.mxu0 %v414_v5  ;;  %522 = vmatprep.subr.mxu1 %v416_v6  ;;  %v411_v12 = vld [vmem:[#allocation5 + $0x1b0] sm:$0xff]  ;;  %v406_v13 = vld [vmem:[#allocation5 + $0x188] sm:$0xff]  ;;  %v408_v14 = vld [vmem:[#allocation5 + $0x198] sm:$0xff]  ;;  %s2173_s28 = smov [#allocation11]  }
  0x7c   : > { %446 = vmatpush1.msra.mxu0 %v413_v7  ;;  %523 = vmatpush1.msra.mxu1 %v415_v8  ;;  %v405_v15 = vld [vmem:[#allocation5 + $0x180] sm:$0xff]  ;;  %v407_v16 = vld [vmem:[#allocation5 + $0x190] sm:$0xff]  ;;  %v402_v17 = vld [vmem:[#allocation5 + $0x168] sm:$0xff]  ;;  %v2392_v5 = vshrl.u32 %v423_v4, 7 }
  0x7d   : > { %447 = vmatprep.subr.mxu0 %v410_v9  ;;  %524 = vmatprep.subr.mxu1 %v412_v10  ;;  %v404_v18 = vld [vmem:[#allocation5 + $0x178] sm:$0xff]  ;;  %v401_v19 = vld [vmem:[#allocation5 + $0x160] sm:$0xff]  ;;  %v403_v20 = vld [vmem:[#allocation5 + $0x170] sm:$0xff] }
  0x7e   : > { %448 = vmatpush1.msra.mxu0 %v409_v11  ;;  %525 = vmatpush1.msra.mxu1 %v411_v12  ;;  %v398_v21 = vld [vmem:[#allocation5 + $0x148] sm:$0xff]  ;;  %v400_v22 = vld [vmem:[#allocation5 + $0x158] sm:$0xff]  ;;  %v397_v23 = vld [vmem:[#allocation5 + $0x140] sm:$0xff]  ;;  %v2395_v6 = vsub.s32 0, %v2392_v5  ;;  %v2398_v7 = vsub.s32 2, %v2392_v5  ;;  %v2401_v9 = vsub.s32 1, %v2392_v5 }
  0x7f   : > { %449 = vmatprep.subr.mxu0 %v406_v13  ;;  %526 = vmatprep.subr.mxu1 %v408_v14  ;;  %v399_v24 = vld [vmem:[#allocation5 + $0x150] sm:$0xff]  ;;  %v394_v25 = vld [vmem:[#allocation5 + $0x128] sm:$0xff]  ;;  %v396_v26 = vld [vmem:[#allocation5 + $0x138] sm:$0xff]  ;;  %v2407_v14 = vsub.s32 3, %v2392_v5  ;;  %vm692_vm0 = vcmp.lt.s32.totalorder %v2392_v5, 1  ;;  %vm721_vm1 = vcmp.lt.s32.totalorder %v2392_v5, 7 }
  0x80   : > { %450 = vmatpush1.msra.mxu0 %v405_v15  ;;  %527 = vmatpush1.msra.mxu1 %v407_v16  ;;  %v393_v27 = vld [vmem:[#allocation5 + $0x120] sm:$0xff]  ;;  %v395_v28 = vld [vmem:[#allocation5 + $0x130] sm:$0xff]  ;;  %v390_v29 = vld [vmem:[#allocation5 + $0x108] sm:$0xff] }
  0x81   : > { %451 = vmatprep.subr.mxu0 %v402_v17  ;;  %528 = vmatprep.subr.mxu1 %v404_v18  ;;  %v392_v30 = vld [vmem:[#allocation5 + $0x118] sm:$0xff]  ;;  %v389_v31 = vld [vmem:[#allocation5 + $0x100] sm:$0xff]  ;;  %v391_v32 = vld [vmem:[#allocation5 + $0x110] sm:$0xff] }
  0x82   : > { %452 = vmatpush1.msra.mxu0 %v401_v19  ;;  %529 = vmatpush1.msra.mxu1 %v403_v20  ;;  %v386_v33 = vld [vmem:[#allocation5 + $0xe8] sm:$0xff]  ;;  %v388_v34 = vld [vmem:[#allocation5 + $0xf8] sm:$0xff]  ;;  %v385_v35 = vld [vmem:[#allocation5 + $0xe0] sm:$0xff] }
  0x83   : > { %453 = vmatprep.subr.mxu0 %v398_v21  ;;  %530 = vmatprep.subr.mxu1 %v400_v22  ;;  %v387_v36 = vld [vmem:[#allocation5 + $0xf0] sm:$0xff]  ;;  %v382_v37 = vld [vmem:[#allocation5 + $0xc8] sm:$0xff]  ;;  %v384_v38 = vld [vmem:[#allocation5 + $0xd8] sm:$0xff] }
  0x84   : > { %454 = vmatpush1.msra.mxu0 %v397_v23  ;;  %531 = vmatpush1.msra.mxu1 %v399_v24  ;;  %v381_v39 = vld [vmem:[#allocation5 + $0xc0] sm:$0xff]  ;;  %v383_v40 = vld [vmem:[#allocation5 + $0xd0] sm:$0xff]  ;;  %v378_v41 = vld [vmem:[#allocation5 + $0xa8] sm:$0xff] }
  0x85   : > { %455 = vmatprep.subr.mxu0 %v394_v25  ;;  %532 = vmatprep.subr.mxu1 %v396_v26  ;;  %v380_v42 = vld [vmem:[#allocation5 + $0xb8] sm:$0xff]  ;;  %v377_v43 = vld [vmem:[#allocation5 + $0xa0] sm:$0xff]  ;;  %v379_v44 = vld [vmem:[#allocation5 + $0xb0] sm:$0xff] }
  0x86   : > { %456 = vmatpush1.msra.mxu0 %v393_v27  ;;  %533 = vmatpush1.msra.mxu1 %v395_v28  ;;  %v374_v45 = vld [vmem:[#allocation5 + $0x88] sm:$0xff]  ;;  %v376_v46 = vld [vmem:[#allocation5 + $0x98] sm:$0xff]  ;;  %v373_v47 = vld [vmem:[#allocation5 + $0x80] sm:$0xff] }
  0x87   : > { %457 = vmatprep.subr.mxu0 %v390_v29  ;;  %534 = vmatprep.subr.mxu1 %v392_v30  ;;  %v375_v48 = vld [vmem:[#allocation5 + $0x90] sm:$0xff]  ;;  %v370_v49 = vld [vmem:[#allocation5 + $0x68] sm:$0xff]  ;;  %v372_v50 = vld [vmem:[#allocation5 + $0x78] sm:$0xff] }
  0x88   : > { %458 = vmatpush1.msra.mxu0 %v389_v31  ;;  %535 = vmatpush1.msra.mxu1 %v391_v32  ;;  %v369_v51 = vld [vmem:[#allocation5 + $0x60] sm:$0xff]  ;;  %v371_v52 = vld [vmem:[#allocation5 + $0x70] sm:$0xff]  ;;  %v366_v53 = vld [vmem:[#allocation5 + $0x48] sm:$0xff] }
  0x89   : > { %459 = vmatprep.subr.mxu0 %v386_v33  ;;  %536 = vmatprep.subr.mxu1 %v388_v34  ;;  %v368_v54 = vld [vmem:[#allocation5 + $0x58] sm:$0xff]  ;;  %v365_v55 = vld [vmem:[#allocation5 + $0x40] sm:$0xff]  ;;  %v367_v56 = vld [vmem:[#allocation5 + $0x50] sm:$0xff] }
  0x8a   : > { %460 = vmatpush1.msra.mxu0 %v385_v35  ;;  %537 = vmatpush1.msra.mxu1 %v387_v36  ;;  %v362_v57 = vld [vmem:[#allocation5 + $0x28] sm:$0xff]  ;;  %v364_v58 = vld [vmem:[#allocation5 + $0x38] sm:$0xff]  ;;  %v361_v59 = vld [vmem:[#allocation5 + $0x20] sm:$0xff] }
  0x8b   : > { %461 = vmatprep.subr.mxu0 %v382_v37  ;;  %538 = vmatprep.subr.mxu1 %v384_v38  ;;  %v363_v60 = vld [vmem:[#allocation5 + $0x30] sm:$0xff]  ;;  %v358_v61 = vld [vmem:[#allocation5 + $0x8] sm:$0xff]  ;;  %v360_v62 = vld [vmem:[#allocation5 + $0x18] sm:$0xff] }
  0x8c   : > { %462 = vmatpush1.msra.mxu0 %v381_v39  ;;  %539 = vmatpush1.msra.mxu1 %v383_v40  ;;  %v357_v63 = vld [vmem:[#allocation5] sm:$0xff]  ;;  %v359_v1 = vld [vmem:[#allocation5 + $0x10] sm:$0xff]  ;;  %v356_v3 = vld [vmem:[%s2371_s22 + $0x8] sm:$0xff] }
  0x8d   : > { %463 = vmatprep.subr.mxu0 %v378_v41  ;;  %540 = vmatprep.subr.mxu1 %v380_v42  ;;  %v355_v2 = vld [vmem:[%s2371_s22] sm:$0xff] }
  0x8e   : > { %464 = vmatpush1.msra.mxu0 %v377_v43  ;;  %541 = vmatpush1.msra.mxu1 %v379_v44  ;;  %v421_v8 = vld [vmem:[#allocation7] sm:$0xf] }
  0x8f   : > { %465 = vmatprep.subr.mxu0 %v374_v45  ;;  %542 = vmatprep.subr.mxu1 %v376_v46  ;;  %v426_v10 = vrot.slane %v421_v8, %v2395_v6  ;;  %v430_v11 = vrot.slane %v421_v8, %v2401_v9  ;;  %v438_v22 = vrot.slane %v421_v8, %v2407_v14 }
  0x90   : > { %466 = vmatpush1.msra.mxu0 %v373_v47  ;;  %543 = vmatpush1.msra.mxu1 %v375_v48 }
  0x91   : > { %467 = vmatprep.subr.mxu0 %v370_v49  ;;  %544 = vmatprep.subr.mxu1 %v372_v50 }
  0x92   : > { %468 = vmatpush1.msra.mxu0 %v369_v51  ;;  %545 = vmatpush1.msra.mxu1 %v371_v52 }
  0x93   : > { %469 = vmatprep.subr.mxu0 %v366_v53  ;;  %546 = vmatprep.subr.mxu1 %v368_v54 }
  0x94   : > { %470 = vmatpush1.msra.mxu0 %v365_v55  ;;  %547 = vmatpush1.msra.mxu1 %v367_v56 }
  0x95   : > { %471 = vmatprep.subr.mxu0 %v362_v57  ;;  %548 = vmatprep.subr.mxu1 %v364_v58 }
  0x96   : > { %472 = vmatpush1.msra.mxu0 %v361_v59  ;;  %549 = vmatpush1.msra.mxu1 %v363_v60 }
  0x97   : > { %473 = vmatprep.subr.mxu0 %v358_v61  ;;  %550 = vmatprep.subr.mxu1 %v360_v62 }
  0x98   : > { %474 = vmatpush1.msra.mxu0 %v357_v63  ;;  %551 = vmatpush1.msra.mxu1 %v359_v1 }
  0x99   : > { %508 = vmatmul.mubr.f32.vlgmr.msra.gmra.mxu0 %v355_v2  ;;  %585 = vmatmul.mubr.f32.vlgmr.msra.gmra.mxu1 %v355_v2 }
  0x9a   : > { %513 = vmatprep.mubr.f32.mxu0 %v2170_v0  ;;  %590 = vmatprep.mubr.f32.mxu1 %v2170_v0  ;;  %v434_v0 = vrot.slane %v421_v8, %v2398_v7 }
  0x9d   : > { %514 = vmatmul.mubr.f32.gmra.mxu0 %v356_v3  ;;  %591 = vmatmul.mubr.f32.gmra.mxu1 %v356_v3 }
 0x159   : > { %v509_v12 = vpop.f32.mrf.mxu0  ;;  %v586_v13 = vpop.f32.mrf.mxu1 }
 0x15a   : > { %v510_v15 = vadd.f32 %v509_v12, %v426_v10  ;;  %v587_v16 = vadd.f32 %v586_v13, %v434_v0 }
 0x15b   : > { %v511_v17 = vpop.f32.mrf.mxu0  ;;  %v588_v18 = vpop.f32.mrf.mxu1 }
 0x15c   : > { %v1693_v19 = vmul.f32 -1.442695, %v510_v15  ;;  %v1695_v20 = vmul.f32 -1.442695, %v587_v16  ;;  %v512_v21 = vadd.f32 %v511_v17, %v430_v11  ;;  %v589_v29 = vadd.f32 %v588_v18, %v438_v22 }
 0x15d   : > { %v515_v23 = vpop.f32.mrf.mxu0  ;;  %v592_v24 = vpop.f32.mrf.mxu1 }
 0x15e   : > { %1889 = vpow2.f32 %v1693_v19  ;;  %v1694_v25 = vmul.f32 -1.442695, %v512_v21  ;;  %v516_v26 = vadd.f32 %v515_v23, %v426_v10  ;;  %v593_v27 = vadd.f32 %v592_v24, %v434_v0 }
 0x15f   : > { %1891 = vpow2.f32 %v1695_v20  ;;  %v594_v31 = vpop.f32.mrf.mxu1  ;;  %v1696_v32 = vmul.f32 -1.442695, %v589_v29  ;;  %v517_v34 = vpop.f32.mrf.mxu0  ;;  %v660_v20 = vand.u32 15, %v2392_v5 }
 0x160   : > { %1893 = vpow2.f32 %v1694_v25  ;;  %v1697_v28 = vmul.f32 -1.442695, %v516_v26  ;;  %v1699_v30 = vmul.f32 -1.442695, %v593_v27  ;;  %v595_v33 = vadd.f32 %v594_v31, %v438_v22  ;;  %v1371_v25 = vld [vmem:[#allocation10 + $0x168] sm:$0xff] }
 0x161   : > { %v518_v35 = vadd.f32 %v517_v34, %v430_v11  ;;  %vm2495_vm2 = vcmp.gt.s32.totalorder %v660_v20, 0  ;;  %v1353_v20 = vld [vmem:[#allocation10 + $0xd8] sm:$0xff] }
 0x162   : > { %1895 = vpow2.f32 %v1697_v28  ;;  %v1700_v36 = vmul.f32 -1.442695, %v595_v33 }
 0x163   : > { %1897 = vpow2.f32 %v1699_v30  ;;  %v1698_v42 = vmul.f32 -1.442695, %v518_v35 }
 0x164   : > { %1899 = vpow2.f32 %v1696_v32  ;;  %v1351_v32 = vld [vmem:[#allocation10 + $0xc8] sm:$0xff] }
 0x165   : > { %1901 = vpow2.f32 %v1700_v36 }
 0x16b   : > { %v1890_v37 = vpop.eup %1889 }
 0x16c   : > { %v1892_v38 = vpop.eup %1891  ;;  %v621_v39 = vadd.f32 1.0, %v1890_v37 }
 0x16d   : > { %v1894_v40 = vpop.eup %1893  ;;  %v623_v41 = vadd.f32 1.0, %v1892_v38 }
 0x16e   : > { %1903 = vrcp.f32 %v621_v39  ;;  %v622_v43 = vadd.f32 1.0, %v1894_v40 }
 0x16f   : > { %v1896_v44 = vpop.eup %1895  ;;  %1905 = vrcp.f32 %v623_v41 }
 0x170   : > { %1907 = vrcp.f32 %v622_v43  ;;  %v625_v45 = vadd.f32 1.0, %v1896_v44  ;;  %v1898_v46 = vpop.eup %1897 }
 0x171   : > { %1909 = vpow2.f32 %v1698_v42  ;;  %v627_v47 = vadd.f32 1.0, %v1898_v46  ;;  %v1900_v48 = vpop.eup %1899 }
 0x172   : > { %1911 = vrcp.f32 %v625_v45  ;;  %v624_v49 = vadd.f32 1.0, %v1900_v48  ;;  %v1902_v50 = vpop.eup %1901 }
 0x173   : > { %1913 = vrcp.f32 %v627_v47  ;;  %v628_v58 = vadd.f32 1.0, %v1902_v50 }
 0x174   : > { %1915 = vrcp.f32 %v624_v49 }
 0x175   : > { %1917 = vrcp.f32 %v628_v58 }
 0x17b   : > { %v1904_v51 = vpop.eup %1903 }
 0x17c   : > { %v1906_v52 = vpop.eup %1905  ;;  %v2410_v53 = vmul.f32 %v1904_v51, %v510_v15 }
 0x17d   : > { %v1908_v54 = vpop.eup %1907  ;;  %v2412_v55 = vmul.f32 %v1906_v52, %v587_v16 }
 0x17e   : > { %v1910_v56 = vpop.eup %1909  ;;  %910 = vrot.lane.b32.xlu0 %v2410_v53, %s2171_s30  ;;  %v2418_v57 = vmul.f32 %v1908_v54, %v512_v21  ;;  %v684_v16 = vrot.slane %v2410_v53, 7  ;;  %v713_v21 = vrot.slane %v2410_v53, 1 }
 0x17f   : > { %918 = vrot.lane.b32.xlu1 %v2412_v55, %s2171_s30  ;;  %v1912_v59 = vpop.eup %1911  ;;  %v626_v60 = vadd.f32 1.0, %v1910_v56  ;;  %v686_v12 = vrot.slane %v2412_v55, 7  ;;  %v715_v22 = vrot.slane %v2412_v55, 1 }
 0x180   : > { %v2424_v61 = vmul.f32 %v1912_v59, %v516_v26  ;;  %v1914_v62 = vpop.eup %1913  ;;  %v714_v42 = vrot.slane %v2418_v57, 1 }
 0x181   : > { %1919 = vrcp.f32 %v626_v60  ;;  %v2430_v63 = vmul.f32 %v1914_v62, %v593_v27  ;;  %v1916_v1 = vpop.eup %1915  ;;  %v655_v27 = vadd.s32 8, %v2392_v5  ;;  %v1357_v5 = vld [vmem:[#allocation10 + $0xf8] sm:$0xff]  ;;  %v1356_v62 = vld [vmem:[#allocation10 + $0xf0] sm:$0xff] }
 0x182   : > { %938 = vrot.lane.b32.xlu0 %v2418_v57, %s2172_s9  ;;  %v2436_v2 = vmul.f32 %v1916_v1, %v589_v29  ;;  %v1918_v3 = vpop.eup %1917  ;;  %v688_v15 = vrot.slane %v2424_v61, 7  ;;  %v717_v18 = vrot.slane %v2424_v61, 1  ;;  %1717 = vmatprep.subr.mxu0 %v1357_v5  ;;  %v1341_v60 = vld [vmem:[#allocation10 + $0x78] sm:$0xff]  ;;  %v1340_v1 = vld [vmem:[#allocation10 + $0x70] sm:$0xff] }
 0x183   : > { %942 = vrot.lane.b32.xlu1 %v2412_v55, %s2172_s9  ;;  %v2446_v10 = vmul.f32 %v1918_v3, %v595_v33  ;;  %v690_v11 = vrot.slane %v2430_v63, 7  ;;  %v719_v19 = vrot.slane %v2430_v63, 1  ;;  %v667_v31 = vand.u32 15, %v655_v27  ;;  %1718 = vmatpush3.msra.mxu0 %v1341_v60  ;;  %v1355_v3 = vld [vmem:[#allocation10 + $0xe8] sm:$0xff]  ;;  %v1386_v27 = vld [vmem:[#allocation10 + $0x1e0] sm:$0xff]  ;;  %v1332_v5 = vld [vmem:[#allocation10 + $0x30] sm:$0xff] }
 0x184   : > { %v2473_v17 = vsel %vm692_vm0, %v684_v16, %v688_v15  ;;  %v2487_v23 = vsel %vm721_vm1, %v713_v21, %v717_v18  ;;  %v697_v26 = vsel %vm692_vm0, %v688_v15, %v684_v16  ;;  %v726_v33 = vsel %vm721_vm1, %v717_v18, %v713_v21  ;;  %1719 = vmatprep.subr.mxu0 %v1356_v62  ;;  %v1354_v15 = vld [vmem:[#allocation10 + $0xe0] sm:$0xff]  ;;  %v1388_v16 = vld [vmem:[#allocation10 + $0x1f0] sm:$0xff]  ;;  %v1387_v21 = vld [vmem:[#allocation10 + $0x1e8] sm:$0xff] }
 0x185   : > { %v2459_v13 = vsel %vm692_vm0, %v686_v12, %v690_v11  ;;  %v2493_v24 = vsel %vm721_vm1, %v715_v22, %v719_v19  ;;  %v699_v28 = vsel %vm692_vm0, %v690_v11, %v686_v12  ;;  %v2508_v29 = vsel %vm2495_vm2, %v697_v26, 0.0  ;;  %1720 = vmatpush3.msra.mxu0 %v1340_v1  ;;  %v1339_v11 = vld [vmem:[#allocation10 + $0x68] sm:$0xff]  ;;  %v1373_v12 = vld [vmem:[#allocation10 + $0x178] sm:$0xff]  ;;  %v1338_v18 = vld [vmem:[#allocation10 + $0x60] sm:$0xff] }
 0x186   : > { %912 = vrot.lane.b32.xlu0 %v2424_v61, %s2171_s30  ;;  %v2514_v30 = vsel %vm2495_vm2, %v699_v28, 0.0  ;;  %vm2520_vm3 = vcmp.lt.s32.totalorder %v667_v31, 15  ;;  %v691_v38 = vrot.slane %v2446_v10, 7  ;;  %v687_v39 = vrot.slane %v2436_v2, 7  ;;  %1721 = vmatprep.subr.mxu0 %v1355_v3  ;;  %v1352_v26 = vld [vmem:[#allocation10 + $0xd0] sm:$0xff]  ;;  %v1370_v31 = vld [vmem:[#allocation10 + $0x160] sm:$0xff] }
 0x187   : > { %934 = vrot.lane.b32.xlu1 %v2410_v53, %s2172_s9  ;;  %v2532_v36 = vsel %vm2520_vm3, %v726_v33, 0.0  ;;  %v720_v43 = vrot.slane %v2446_v10, 1  ;;  %v716_v45 = vrot.slane %v2436_v2, 1  ;;  %v728_v51 = vsel %vm721_vm1, %v719_v19, %v715_v22  ;;  %1722 = vmatpush3.msra.mxu0 %v1339_v11  ;;  %v1372_v19 = vld [vmem:[#allocation10 + $0x170] sm:$0xff]  ;;  %v1337_v22 = vld [vmem:[#allocation10 + $0x58] sm:$0xff]  ;;  %v1366_v60 = vld [vmem:[#allocation10 + $0x140] sm:$0xff] }
 0x188   : > { %v2548_v40 = vsel %vm692_vm0, %v687_v39, %v691_v38  ;;  %v700_v46 = vsel %vm692_vm0, %v691_v38, %v687_v39  ;;  %v2600_v52 = vsel %vm2520_vm3, %v728_v51, 0.0  ;;  %1723 = vmatprep.subr.mxu0 %v1354_v15  ;;  %v1336_v28 = vld [vmem:[#allocation10 + $0x50] sm:$0xff]  ;;  %v1385_v33 = vld [vmem:[#allocation10 + $0x1d8] sm:$0xff]  ;;  %v1350_v38 = vld [vmem:[#allocation10 + $0xc0] sm:$0xff] }
 0x189   : > { %v2568_v47 = vsel %vm721_vm1, %v716_v45, %v720_v43  ;;  %v2574_v48 = vsel %vm2495_vm2, %v700_v46, 0.0  ;;  %v729_v54 = vsel %vm721_vm1, %v720_v43, %v716_v45  ;;  %1724 = vmatpush3.msra.mxu0 %v1338_v18  ;;  %v1384_v39 = vld [vmem:[#allocation10 + $0x1d0] sm:$0xff]  ;;  %v1349_v43 = vld [vmem:[#allocation10 + $0xb8] sm:$0xff]  ;;  %v1383_v45 = vld [vmem:[#allocation10 + $0x1c8] sm:$0xff] }
 0x18a   : > { %920 = vrot.lane.b32.xlu0 %v2430_v63, %s2171_s30  ;;  %v2612_v58 = vsel %vm2520_vm3, %v729_v54, 0.0  ;;  %1725 = vmatprep.subr.mxu0 %v1353_v20  ;;  %v1333_v46 = vld [vmem:[#allocation10 + $0x38] sm:$0xff]  ;;  %v1348_v51 = vld [vmem:[#allocation10 + $0xb0] sm:$0xff]  ;;  %v1382_v54 = vld [vmem:[#allocation10 + $0x1c0] sm:$0xff] }
 0x18b   : > { %914 = vrot.lane.b32.xlu1 %v2418_v57, %s2171_s30  ;;  %1726 = vmatpush3.msra.mxu0 %v1337_v22  ;;  %v1347_v1 = vld [vmem:[#allocation10 + $0xa8] sm:$0xff]  ;;  %v1381_v3 = vld [vmem:[#allocation10 + $0x1b8] sm:$0xff]  ;;  %v1380_v15 = vld [vmem:[#allocation10 + $0x1b0] sm:$0xff] }
 0x18c   : > { %1727 = vmatprep.subr.mxu0 %v1352_v26  ;;  %v1331_v11 = vld [vmem:[#allocation10 + $0x28] sm:$0xff]  ;;  %v1364_v18 = vld [vmem:[#allocation10 + $0x130] sm:$0xff]  ;;  %v1329_v22 = vld [vmem:[#allocation10 + $0x18] sm:$0xff] }
 0x18d   : > { %1728 = vmatpush3.msra.mxu0 %v1336_v28  ;;  %v1379_v20 = vld [vmem:[#allocation10 + $0x1a8] sm:$0xff]  ;;  %v1344_v26 = vld [vmem:[#allocation10 + $0x90] sm:$0xff]  ;;  %v1378_v28 = vld [vmem:[#allocation10 + $0x1a0] sm:$0xff] }
 0x18e   : > { %944 = vrot.lane.b32.xlu0 %v2430_v63, %s2172_s9  ;;  %v1920_v8 = vpop.eup %1919  ;;  %1729 = vmatprep.subr.mxu0 %v1351_v32  ;;  %v1362_v32 = vld [vmem:[#allocation10 + $0x120] sm:$0xff] }
 0x18f   : > { %922 = vrot.lane.b32.xlu1 %v2436_v2, %s2171_s30  ;;  %v2448_v0 = vmul.f32 %v1920_v8, %v518_v35  ;;  %v685_v35 = vrot.slane %v2418_v57, 7  ;;  %v1389_v8 = vld [vmem:[#allocation10 + $0x1f8] sm:$0xff] }
 0x190   : > { %1755 = vmatprep.subr.mxu1 %v1389_v8 }
 0x191   : > { %v689_v34 = vrot.slane %v2448_v0, 7  ;;  %v718_v41 = vrot.slane %v2448_v0, 1  ;;  %1756 = vmatpush3.msra.mxu1 %v1373_v12  ;;  %v1365_v12 = vld [vmem:[#allocation10 + $0x138] sm:$0xff] }
 0x192   : > { %936 = vrot.lane.b32.xlu0 %v2424_v61, %s2172_s9  ;;  %1757 = vmatprep.subr.mxu1 %v1388_v16  ;;  %v1330_v16 = vld [vmem:[#allocation10 + $0x20] sm:$0xff] }
 0x193   : > { %946 = vrot.lane.b32.xlu1 %v2436_v2, %s2172_s9  ;;  %v2538_v37 = vsel %vm692_vm0, %v685_v35, %v689_v34  ;;  %v2559_v44 = vsel %vm721_vm1, %v714_v42, %v718_v41  ;;  %v698_v49 = vsel %vm692_vm0, %v689_v34, %v685_v35  ;;  %v727_v56 = vsel %vm721_vm1, %v718_v41, %v714_v42  ;;  %v1335_v34 = vld [vmem:[#allocation10 + $0x48] sm:$0xff]  ;;  %v1369_v35 = vld [vmem:[#allocation10 + $0x158] sm:$0xff]  ;;  %v1334_v41 = vld [vmem:[#allocation10 + $0x40] sm:$0xff] }
 0x194   : > { %v2582_v50 = vsel %vm2495_vm2, %v698_v49, 0.0  ;;  %v2618_v59 = vsel %vm2520_vm3, %v727_v56, 0.0  ;;  %1758 = vmatpush3.msra.mxu1 %v1372_v19  ;;  %1730 = vmatpush3.msra.mxu0 %v1335_v34  ;;  %v1368_v42 = vld [vmem:[#allocation10 + $0x150] sm:$0xff]  ;;  %v1367_v49 = vld [vmem:[#allocation10 + $0x148] sm:$0xff]  ;;  %v2631_v56 = vand.u32 127, %v423_v4  ;;  %v1346_v4 = vld [vmem:[#allocation10 + $0xa0] sm:$0xff] }
 0x195   : > { %1759 = vmatprep.subr.mxu1 %v1387_v21  ;;  %1731 = vmatprep.subr.mxu0 %v1350_v38  ;;  %v1345_v19 = vld [vmem:[#allocation10 + $0x98] sm:$0xff]  ;;  %v1343_v34 = vld [vmem:[#allocation10 + $0x88] sm:$0xff] }
 0x196   : > { %924 = vrot.lane.b32.xlu0 %v2446_v10, %s2171_s30  ;;  %1760 = vmatpush3.msra.mxu1 %v1371_v25  ;;  %vm785_vm4 = vcmp.lt.s32.totalorder %v2631_v56, 96  ;;  %v1363_v25 = vld [vmem:[#allocation10 + $0x128] sm:$0xff]  ;;  %vm760_vm5 = vcmp.lt.s32.totalorder %v2631_v56, 32 }
 0x197   : > { %916 = vrot.lane.b32.xlu1 %v2448_v0, %s2171_s30  ;;  %1761 = vmatprep.subr.mxu1 %v1386_v27  ;;  %v1327_v38 = vld [vmem:[#allocation10 + $0x8] sm:$0xff] }
 0x198   : > { %1762 = vmatpush3.msra.mxu1 %v1370_v31  ;;  %1732 = vmatpush3.msra.mxu0 %v1334_v41  ;;  %v1328_v31 = vld [vmem:[#allocation10 + $0x10] sm:$0xff] }
 0x199   : > { %1763 = vmatprep.subr.mxu1 %v1385_v33  ;;  %1733 = vmatprep.subr.mxu0 %v1349_v43  ;;  %v1376_v43 = vld [vmem:[#allocation10 + $0x190] sm:$0xff] }
 0x19a   : > { %752 = vrot.lane.b32.xlu0 %v2459_v13, %s2171_s30  ;;  %1764 = vmatpush3.msra.mxu1 %v1369_v35  ;;  %v1377_v35 = vld [vmem:[#allocation10 + $0x198] sm:$0xff] }
 0x19b   : > { %940 = vrot.lane.b32.xlu1 %v2448_v0, %s2172_s9  ;;  %1765 = vmatprep.subr.mxu1 %v1384_v39  ;;  %v1361_v39 = vld [vmem:[#allocation10 + $0x118] sm:$0xff] }
 0x19c   : > { %1766 = vmatpush3.msra.mxu1 %v1368_v42  ;;  %1734 = vmatpush3.msra.mxu0 %v1333_v46  ;;  %v1342_v42 = vld [vmem:[#allocation10 + $0x80] sm:$0xff] }
 0x19d   : > { %1767 = vmatprep.subr.mxu1 %v1383_v45  ;;  %1735 = vmatprep.subr.mxu0 %v1348_v51  ;;  %v1326_v46 = vld [vmem:[#allocation10] sm:$0xff] }
 0x19e   : > { %779 = vrot.lane.b32.xlu0 %v2459_v13, %s2172_s9  ;;  %1768 = vmatpush3.msra.mxu1 %v1367_v49  ;;  %v1360_v49 = vld [vmem:[#allocation10 + $0x110] sm:$0xff] }
 0x19f   : > { %948 = vrot.lane.b32.xlu1 %v2446_v10, %s2172_s9  ;;  %1769 = vmatprep.subr.mxu1 %v1382_v54  ;;  %v1375_v54 = vld [vmem:[#allocation10 + $0x188] sm:$0xff] }
 0x1a0   : > { %1736 = vmatpush3.msra.mxu0 %v1332_v5  ;;  %1770 = vmatpush3.msra.mxu1 %v1366_v60  ;;  %v1359_v5 = vld [vmem:[#allocation10 + $0x108] sm:$0xff] }
 0x1a1   : > { %1737 = vmatprep.subr.mxu0 %v1347_v1  ;;  %1771 = vmatprep.subr.mxu1 %v1381_v3  ;;  %v1374_v1 = vld [vmem:[#allocation10 + $0x180] sm:$0xff] }
 0x1a2   : > { %771 = vrot.lane.b32.xlu0 %v2473_v17, %s2172_s9  ;;  %1738 = vmatpush3.msra.mxu0 %v1331_v11  ;;  %v1358_v11 = vld [vmem:[#allocation10 + $0x100] sm:$0xff] }
 0x1a3   : > { %744 = vrot.lane.b32.xlu1 %v2473_v17, %s2171_s30  ;;  %1772 = vmatpush3.msra.mxu1 %v1365_v12 }
 0x1a4   : > { %1739 = vmatprep.subr.mxu0 %v1346_v4  ;;  %1773 = vmatprep.subr.mxu1 %v1380_v15 }
 0x1a5   : > { %1740 = vmatpush3.msra.mxu0 %v1330_v16  ;;  %1774 = vmatpush3.msra.mxu1 %v1364_v18 }
 0x1a6   : > { %1075 = vrot.lane.b32.xlu0 %v2487_v23, %s2171_s30  ;;  %1741 = vmatprep.subr.mxu0 %v1345_v19 }
 0x1a7   : > { %1083 = vrot.lane.b32.xlu1 %v2493_v24, %s2171_s30  ;;  %1775 = vmatprep.subr.mxu1 %v1379_v20 }
 0x1a8   : > { %1742 = vmatpush3.msra.mxu0 %v1329_v22  ;;  %1776 = vmatpush3.msra.mxu1 %v1363_v25 }
 0x1a9   : > { %1743 = vmatprep.subr.mxu0 %v1344_v26  ;;  %1777 = vmatprep.subr.mxu1 %v1378_v28 }
 0x1aa   : > { %742 = vrot.lane.b32.xlu0 %v2508_v29, %s2171_s30  ;;  %1744 = vmatpush3.msra.mxu0 %v1328_v31 }
 0x1ab   : > { %750 = vrot.lane.b32.xlu1 %v2514_v30, %s2171_s30  ;;  %1778 = vmatpush3.msra.mxu1 %v1362_v32 }
 0x1ac   : > { %1745 = vmatprep.subr.mxu0 %v1343_v34  ;;  %1779 = vmatprep.subr.mxu1 %v1377_v35  ;;  %v998_v34 = vld [vmem:[#allocation8 + $0x4] ss:$8 sm:$0xf]  ;;  %v833_v35 = vld [vmem:[#allocation8 + $0x1] ss:$8 sm:$0xf] }
 0x1ad   : > { %1746 = vmatpush3.msra.mxu0 %v1327_v38  ;;  %1780 = vmatpush3.msra.mxu1 %v1361_v39  ;;  %v1163_v38 = vld [vmem:[#allocation8 + $0x7] ss:$8 sm:$0xf] }
 0x1ae   : > { %769 = vrot.lane.b32.xlu0 %v2508_v29, %s2172_s9  ;;  %1747 = vmatprep.subr.mxu0 %v1342_v42  ;;  %v1037_v42 = vld [vmem:[#allocation8 + $0x5] ss:$8 sm:$0xf] }
 0x1af   : > { %777 = vrot.lane.b32.xlu1 %v2514_v30, %s2172_s9  ;;  %1781 = vmatprep.subr.mxu1 %v1376_v43 }
 0x1b0   : > { %1748 = vmatpush3.msra.mxu0 %v1326_v46  ;;  %1782 = vmatpush3.msra.mxu1 %v1360_v49  ;;  %v1011_v46 = vrot.slane %v998_v34, %v2398_v7  ;;  %v846_v49 = vrot.slane %v833_v35, %v2398_v7 }
 0x1b1   : > { %1783 = vmatprep.subr.mxu1 %v1375_v54  ;;  %v838_v54 = vrot.slane %v833_v35, %v2395_v6 }
 0x1b2   : > { %1077 = vrot.lane.b32.xlu0 %v2532_v36, %s2171_s30  ;;  %1784 = vmatpush3.msra.mxu1 %v1359_v5  ;;  %v1168_v5 = vrot.slane %v1163_v38, %v2395_v6 }
 0x1b3   : > { %775 = vrot.lane.b32.xlu1 %v2538_v37, %s2172_s9  ;;  %1785 = vmatprep.subr.mxu1 %v1374_v1  ;;  %v959_v1 = vld [vmem:[#allocation8 + $0x3] ss:$8 sm:$0xf] }
 0x1b4   : > { %1786 = vmatpush3.msra.mxu1 %v1358_v11  ;;  %v1007_v11 = vrot.slane %v998_v34, %v2401_v9 }
 0x1b6   : > { %748 = vrot.lane.b32.xlu0 %v2538_v37, %s2171_s30 }
 0x1b7   : > { %783 = vrot.lane.b32.xlu1 %v2548_v40, %s2172_s9 }
 0x1ba   : > { %756 = vrot.lane.b32.xlu0 %v2548_v40, %s2171_s30 }
 0x1bb   : > { %1079 = vrot.lane.b32.xlu1 %v2559_v44, %s2171_s30 }
 0x1be   : > { %1087 = vrot.lane.b32.xlu0 %v2568_v47, %s2171_s30 }
 0x1bf   : > { %754 = vrot.lane.b32.xlu1 %v2574_v48, %s2171_s30 }
 0x1c2   : > { %746 = vrot.lane.b32.xlu0 %v2582_v50, %s2171_s30 }
 0x1c3   : > { %1107 = vrot.lane.b32.xlu1 %v2493_v24, %s2172_s9 }
 0x1c6   : > { %773 = vrot.lane.b32.xlu0 %v2582_v50, %s2172_s9 }
 0x1c7   : > { %1099 = vrot.lane.b32.xlu1 %v2487_v23, %s2172_s9 }
 0x1ca   : > { %1103 = vrot.lane.b32.xlu0 %v2559_v44, %s2172_s9 }
 0x1cb   : > { %781 = vrot.lane.b32.xlu1 %v2574_v48, %s2172_s9 }
 0x1ce   : > { %1085 = vrot.lane.b32.xlu0 %v2600_v52, %s2171_s30 }
 0x1cf   : > { %1111 = vrot.lane.b32.xlu1 %v2568_v47, %s2172_s9 }
 0x1d2   : > { %1089 = vrot.lane.b32.xlu0 %v2612_v58, %s2171_s30 }
 0x1d3   : > { %1081 = vrot.lane.b32.xlu1 %v2618_v59, %s2171_s30  ;;  %s2087_s30 = scalar_lea.vmem %s3120_s10, 256 }
 0x1d4   : > { %p2088_p12 = scmp.ne.s32.totalorder %s3120_s10, %s2087_s30 }
 0x1d6   : > { %1105 = vrot.lane.b32.xlu0 %v2618_v59, %s2172_s9  ;;  %p2089_p9 = pnand %p2088_p12, %p3286_p1 }
 0x1d7   : > { %1109 = vrot.lane.b32.xlu1 %v2600_v52, %s2172_s9 }
 0x1d8   : > { %p2090_p13 = pneg %p2089_p9 }
 0x1da   : > { %1101 = vrot.lane.b32.xlu0 %v2532_v36, %s2172_s9 }
 0x1db   : > { %1113 = vrot.lane.b32.xlu1 %v2612_v58, %s2172_s9  ;;  %s2091_s9 = sshll.u32 %s2173_s28, 4  ;;  %s2092_s9 = int_to_ptr.vmem [resolvable:$false] %s2091_s9 }
 0x1dc   : > { %s2093_s17 = scalar_lea.vmem %s2092_s9, 512  ;;  %p2094_p2 = scmp.lt.s32.totalorder %s3120_s10, %s2092_s9 }
 0x1dd   : > { %p2095_p0 = scmp.lt.s32.totalorder %s2093_s17, %s2087_s30 }
 0x1df   : > { %p2096_p5 = por %p2095_p0, %p2094_p2 }
 0x1e1   : > { %p2097_p10 = pnand %p2096_p5, %p2090_p13 }
 0x1f0   : > { %v2633_v62 = vpop.permute.xlu0 %910 }
 0x1f1   : > { %3220 = vst [vmem:[#allocation16_spill] sm:$0xff] %v2633_v62  ;;  %v2635_v8 = vpop.permute.xlu1 %918 }
 0x1f4   : > { %v939_v21 = vpop.permute.xlu0 %938 }
 0x1f5   : > { %v943_v27 = vpop.permute.xlu1 %942 }
 0x1f6   : > { %v2640_v33 = vsel %vm785_vm4, %v939_v21, %v943_v27 }
 0x1f7   : > { %3221 = vst [vmem:[#allocation17_spill] sm:$0xff] %v2640_v33  ;;  %v2734_v33 = vrot.slane %v959_v1, %v2407_v14 }
 0x1f8   : > { %v2642_v41 = vpop.permute.xlu0 %912 }
 0x1f9   : > { %v935_v45 = vpop.permute.xlu1 %934 }
 0x1fa   : > { %v2646_v51 = vsel %vm785_vm4, %v935_v45, %v939_v21 }
 0x1fb   : > { %3222 = vst [vmem:[#allocation18_spill] sm:$0xff] %v2646_v51  ;;  %v2723_v51 = vrot.slane %v959_v1, %v2398_v7 }
 0x1fc   : > { %v2649_v60 = vpop.permute.xlu0 %920 }
 0x1fd   : > { %v2651_v3 = vpop.permute.xlu1 %914 }
 0x1fe   : > { %3223 = vst [vmem:[#allocation19_spill] sm:$0xff] %v2651_v3  ;;  %v2657_v12 = vsel %vm760_vm5, %v2651_v3, %v2635_v8  ;;  %v2720_v3 = vrot.slane %v959_v1, %v2401_v9 }
 0x1ff   : > { %3224 = vst [vmem:[#allocation20_spill] sm:$0xff] %v2657_v12  ;;  %v2712_v12 = vrot.slane %v1037_v42, %v2401_v9 }
 0x200   : > { %v2659_v4 = vpop.permute.xlu0 %944 }
 0x201   : > { %v2661_v15 = vpop.permute.xlu1 %922  ;;  %3232 = vst [vmem:[#allocation28_spill] sm:$0xff] %v2712_v12  ;;  %v2743_v12 = vmul.f32 %v1011_v46, %v2412_v55  ;;  %v2764_v55 = vmul.f32 %v1168_v5, %v2532_v36  ;;  %v872_v36 = vld [vmem:[#allocation8 + $0x2] ss:$8 sm:$0xf] }
 0x202   : > { %3225 = vst [vmem:[#allocation21_spill] sm:$0xff] %v2661_v15  ;;  %v2667_v16 = vsel %vm760_vm5, %v2635_v8, %v2661_v15  ;;  %v2715_v15 = vrot.slane %v1037_v42, %v2395_v6 }
 0x203   : > { %3226 = vst [vmem:[#allocation22_spill] sm:$0xff] %v2667_v16  ;;  %v1180_v16 = vrot.slane %v1163_v38, %v2407_v14  ;;  %3237 = vst [vmem:[#allocation33_spill] sm:$0xff] %v2743_v12 }
 0x204   : > { %v2669_v18 = vpop.permute.xlu0 %936  ;;  %3233 = vst [vmem:[#allocation29_spill] sm:$0xff] %v2715_v15  ;;  %v2737_v15 = vrot.slane %v1037_v42, %v2398_v7  ;;  %3240 = vst [vmem:[#allocation36_spill] sm:$0xff] %v2764_v55 }
 0x205   : > { %3227 = vst [vmem:[#allocation23_spill] sm:$0xff] %v2669_v18  ;;  %v947_v19 = vpop.permute.xlu1 %946  ;;  %v2746_v18 = vmul.f32 %v846_v49, %v2459_v13 }
 0x206   : > { %v2673_v20 = vsel %vm785_vm4, %v943_v27, %v947_v19  ;;  %v2677_v21 = vsel %vm785_vm4, %v947_v19, %v935_v45  ;;  %v1003_v45 = vrot.slane %v998_v34, %v2395_v6  ;;  %v1176_v19 = vrot.slane %v1163_v38, %v2398_v7 }
 0x207   : > { %3228 = vst [vmem:[#allocation24_spill] sm:$0xff] %v2673_v20  ;;  %3229 = vst [vmem:[#allocation25_spill] sm:$0xff] %v2677_v21  ;;  %v850_v21 = vrot.slane %v833_v35, %v2407_v14  ;;  %v1172_v20 = vrot.slane %v1163_v38, %v2401_v9 }
 0x208   : > { %v2679_v22 = vpop.permute.xlu0 %924  ;;  %v2731_v38 = vmul.f32 %v1003_v45, %v2410_v53  ;;  %v2752_v53 = vmul.f32 %v1168_v5, %v2487_v23 }
 0x209   : > { %v2681_v25 = vpop.permute.xlu1 %916  ;;  %v2773_v23 = vmul.f32 %v1172_v20, %v2559_v44  ;;  %v794_v44 = vld [vmem:[#allocation8] ss:$8 sm:$0xf] }
 0x20a   : > { %3236 = vst [vmem:[#allocation32_spill] sm:$0xff] %v2731_v38  ;;  %3238 = vst [vmem:[#allocation34_spill] sm:$0xff] %v2752_v53  ;;  %v2758_v38 = vmul.f32 %v838_v54, %v2508_v29  ;;  %v2779_v29 = vmul.f32 %v850_v21, %v2574_v48  ;;  %v2799_v48 = vmul.f32 %v1172_v20, %v2618_v59 }
 0x20b   : > { %3241 = vst [vmem:[#allocation37_spill] sm:$0xff] %v2773_v23  ;;  %v2819_v59 = vmul.f32 %v1011_v46, %v2430_v63  ;;  %v2822_v20 = vrot.slane %v794_v44, %v2401_v9  ;;  %v2837_v63 = vrot.slane %v794_v44, %v2395_v6  ;;  %v2840_v46 = vrot.slane %v794_v44, %v2407_v14 }
 0x20c   : > { %v2683_v26 = vpop.permute.xlu0 %752  ;;  %3246 = vst [vmem:[#allocation42_spill] sm:$0xff] %v2799_v48  ;;  %v929_v55 = vsel %vm760_vm5, %v2681_v25, %v2649_v60 }
 0x20d   : > { %v2685_v28 = vpop.permute.xlu1 %940 }
 0x210   : > { %v2687_v8 = vpop.permute.xlu0 %779 }
 0x211   : > { %v2689_v31 = vpop.permute.xlu1 %948 }
 0x214   : > { %v2691_v32 = vpop.permute.xlu0 %771 }
 0x215   : > { %v2693_v27 = vpop.permute.xlu1 %744 }
 0x218   : > { %v2695_v39 = vpop.permute.xlu0 %1075 }
 0x219   : > { %3230 = vst [vmem:[#allocation26_spill] sm:$0xff] %v2695_v39  ;;  %v2697_v43 = vpop.permute.xlu1 %1083  ;;  %v842_v39 = vrot.slane %v833_v35, %v2401_v9 }
 0x21a   : > { %3231 = vst [vmem:[#allocation27_spill] sm:$0xff] %v2697_v43  ;;  %v1015_v43 = vrot.slane %v998_v34, %v2407_v14  ;;  %v2726_v34 = vrot.slane %v959_v1, %v2395_v6  ;;  %v2755_v1 = vmul.f32 %v1176_v19, %v2493_v24  ;;  %v2776_v24 = vmul.f32 %v1180_v16, %v2568_v47 }
 0x21b   : > { %v860_v13 = vmul.f32 %v842_v39, %v2538_v37  ;;  %v2787_v37 = vmul.f32 %v1176_v19, %v2600_v52  ;;  %v2796_v47 = vmul.f32 %v1180_v16, %v2612_v58  ;;  %v1202_v58 = vld [vmem:[#allocation8 + $0x20] ss:$8 sm:$0xf]  ;;  %v2816_v16 = vmul.f32 %v1007_v11, %v2448_v0  ;;  %v1240_v0 = vld [vmem:[%s3173_s4] sm:$0xf] }
 0x21c   : > { %v2717_v62 = vpop.permute.xlu0 %742  ;;  %3239 = vst [vmem:[#allocation35_spill] sm:$0xff] %v2755_v1  ;;  %3242 = vst [vmem:[#allocation38_spill] sm:$0xff] %v2776_v24  ;;  %v2805_v52 = vmul.f32 %v1015_v43, %v2446_v10  ;;  %v2825_v10 = vrot.slane %v794_v44, %v2398_v7  ;;  %v2858_v48 = vrot.slane %v1202_v58, %v2401_v9 }
 0x21d   : > { %3234 = vst [vmem:[#allocation30_spill] sm:$0xff] %v2717_v62  ;;  %v2728_v35 = vpop.permute.xlu1 %750  ;;  %v2740_v62 = vmul.f32 %v1007_v11, %v2418_v57  ;;  %v2761_v57 = vmul.f32 %v846_v49, %v2514_v30  ;;  %v2784_v49 = vmul.f32 %v842_v39, %v2582_v50  ;;  %3243 = vst [vmem:[#allocation39_spill] sm:$0xff] %v2787_v37 }
 0x21e   : > { %3235 = vst [vmem:[#allocation31_spill] sm:$0xff] %v2728_v35  ;;  %v2749_v35 = vmul.f32 %v838_v54, %v2473_v17  ;;  %v2770_v17 = vmul.f32 %v850_v21, %v2548_v40  ;;  %v2790_v40 = vrot.slane %v1037_v42, %v2407_v14  ;;  %v2793_v54 = vmul.f32 %v1015_v43, %v2436_v2  ;;  %v1124_v21 = vld [vmem:[#allocation8 + $0x6] ss:$8 sm:$0xf] }
 0x21f   : > { %3245 = vst [vmem:[#allocation41_spill] sm:$0xff] %v2796_v47  ;;  %v2802_v50 = vmul.f32 %v1003_v45, %v2424_v61  ;;  %v2810_v42 = vrot.slane %v872_v36, %v2395_v6  ;;  %v2813_v2 = vrot.slane %v872_v36, %v2401_v9  ;;  %v2828_v43 = vrot.slane %v872_v36, %v2398_v7 }
 0x220   : > { %v2767_v12 = vpop.permute.xlu0 %769  ;;  %3244 = vst [vmem:[#allocation40_spill] sm:$0xff] %v2793_v54  ;;  %v2831_v45 = vrot.slane %v872_v36, %v2407_v14  ;;  %v2843_v5 = vrot.slane %v1124_v21, %v2401_v9  ;;  %v2846_v11 = vrot.slane %v1124_v21, %v2398_v7  ;;  %v2849_v19 = vrot.slane %v1124_v21, %v2395_v6 }
 0x221   : > { %v2781_v30 = vpop.permute.xlu1 %777  ;;  %v2852_v36 = vrot.slane %v1124_v21, %v2407_v14  ;;  %v2855_v37 = vrot.slane %v1202_v58, %v2395_v6  ;;  %3248 = vst [vmem:[#allocation44_spill] sm:$0xff] %v2858_v48  ;;  %v2864_v24 = vrot.slane %v1240_v0, %v2395_v6  ;;  %v2867_v1 = vrot.slane %v1202_v58, %v2398_v7 }
 0x222   : > { %v2870_v21 = vrot.slane %v1202_v58, %v2407_v14  ;;  %v2883_v23 = vrot.slane %v1240_v0, %v2401_v9  ;;  %v931_v58 = vsel %vm760_vm5, %v2642_v41, %v2681_v25  ;;  %v933_v9 = vsel %vm760_vm5, %v2679_v22, %v2642_v41 }
 0x223   : > { %3249 = vst [vmem:[#allocation45_spill] sm:$0xff] %v2864_v24  ;;  %3250 = vst [vmem:[#allocation46_spill] sm:$0xff] %v2867_v1  ;;  %v986_v48 = vmul.f32 %v2720_v3, %v931_v58  ;;  %v987_v41 = vmul.f32 %v2723_v51, %v929_v55  ;;  %v953_v55 = vsel %vm785_vm4, %v2685_v28, %v2659_v4 }
 0x224   : > { %v2807_v39 = vpop.permute.xlu0 %1077  ;;  %3251 = vst [vmem:[#allocation47_spill] sm:$0xff] %v2870_v21  ;;  %3252 = vst [vmem:[#allocation48_spill] sm:$0xff] %v2883_v23 }
 0x225   : > { %3247 = vst [vmem:[#allocation43_spill] sm:$0xff] %v2807_v39  ;;  %v776_v61 = vpop.permute.xlu1 %775 }
 0x226   : > { %v789_v44 = vsel %vm785_vm4, %v776_v61, %v2687_v8  ;;  %v791_v25 = vsel %vm785_vm4, %v2691_v32, %v776_v61 }
 0x228   : > { %v749_v47 = vpop.permute.xlu0 %748 }
 0x229   : > { %v764_v54 = vsel %vm760_vm5, %v749_v47, %v2683_v26  ;;  %v766_v6 = vsel %vm760_vm5, %v2693_v27, %v749_v47  ;;  %v784_v24 = vpop.permute.xlu1 %783  ;;  %v927_v47 = vsel %vm760_vm5, %v2649_v60, %v2679_v22 }
 0x22a   : > { %v821_v53 = vmul.f32 %v2822_v20, %v766_v6  ;;  %v822_v39 = vmul.f32 %v2825_v10, %v764_v54  ;;  %v787_v21 = vsel %vm785_vm4, %v2687_v8, %v784_v24  ;;  %v899_v54 = vmul.f32 %v2813_v2, %v789_v44 }
 0x22b   : > { %v793_v8 = vsel %vm785_vm4, %v784_v24, %v2691_v32  ;;  %v900_v60 = vmul.f32 %v2828_v43, %v787_v21 }
 0x22c   : > { %v868_v6 = vadd.f32 %v860_v13, %v821_v53  ;;  %v869_v23 = vadd.f32 %v2746_v18, %v822_v39  ;;  %v757_v1 = vpop.permute.xlu0 %756 }
 0x22d   : > { %v762_v22 = vsel %vm760_vm5, %v2683_v26, %v757_v1  ;;  %v768_v53 = vsel %vm760_vm5, %v757_v1, %v2693_v27  ;;  %v2919_v18 = vpop.permute.xlu1 %1079  ;;  %v951_v26 = vsel %vm785_vm4, %v2659_v4, %v2689_v31  ;;  %v898_v27 = vmul.f32 %v2810_v42, %v791_v25  ;;  %v3253_v25 = vld [vmem:[#allocation23_spill] sm:$0xff] }
 0x22e   : > { %v907_v13 = vadd.f32 %v899_v54, %v868_v6  ;;  %v908_v39 = vadd.f32 %v900_v60, %v869_v23  ;;  %v820_v32 = vmul.f32 %v2837_v63, %v768_v53  ;;  %v823_v24 = vmul.f32 %v2840_v46, %v762_v22  ;;  %v3255_v53 = vld [vmem:[#allocation30_spill] sm:$0xff] }
 0x22f   : > { %v901_v1 = vmul.f32 %v2831_v45, %v793_v8  ;;  %v985_v54 = vmul.f32 %v2726_v34, %v933_v9  ;;  %v988_v6 = vmul.f32 %v2734_v33, %v927_v47  ;;  %v2938_v22 = vrot.slane %v1240_v0, %v2398_v7 }
 0x230   : > { %v994_v61 = vadd.f32 %v986_v48, %v907_v13  ;;  %v995_v23 = vadd.f32 %v987_v41, %v908_v39  ;;  %v867_v44 = vadd.f32 %v2749_v35, %v820_v32  ;;  %v870_v21 = vadd.f32 %v2770_v17, %v823_v24  ;;  %v1088_v58 = vpop.permute.xlu0 %1087  ;;  %v3254_v35 = vld [vmem:[#allocation28_spill] sm:$0xff]  ;;  %v3256_v24 = vld [vmem:[#allocation31_spill] sm:$0xff] }
 0x231   : > { %v755_v60 = vpop.permute.xlu1 %754  ;;  %v2941_v4 = vrot.slane %v1240_v0, %v2407_v14  ;;  %v955_v48 = vsel %vm785_vm4, %v3253_v25, %v2685_v28  ;;  %v1064_v8 = vmul.f32 %v3254_v35, %v953_v55  ;;  %v1065_v9 = vmul.f32 %v2737_v15, %v951_v26 }
 0x232   : > { %v906_v17 = vadd.f32 %v898_v27, %v867_v44  ;;  %v909_v41 = vadd.f32 %v901_v1, %v870_v21  ;;  %v767_v47 = vsel %vm760_vm5, %v755_v60, %v3255_v53  ;;  %v1033_v7 = vadd.f32 %v2816_v16, %v994_v61  ;;  %v3258_v61 = vld [vmem:[#allocation18_spill] sm:$0xff] }
 0x233   : > { %v1034_v14 = vadd.f32 %v2819_v59, %v995_v23  ;;  %v957_v0 = vsel %vm785_vm4, %v2689_v31, %v3253_v25  ;;  %v816_v39 = vmul.f32 %v2837_v63, %v767_v47  ;;  %v761_v55 = vsel %vm760_vm5, %v3256_v24, %v755_v60  ;;  %v3257_v31 = vld [vmem:[#allocation17_spill] sm:$0xff] }
 0x234   : > { %v993_v28 = vadd.f32 %v985_v54, %v906_v17  ;;  %v996_v13 = vadd.f32 %v988_v6, %v909_v41  ;;  %v747_v32 = vpop.permute.xlu0 %746  ;;  %v2967_v59 = vadd.f32 %v1064_v8, %v1033_v7  ;;  %v1060_v1 = vmul.f32 %v3254_v35, %v3257_v31  ;;  %v3259_v63 = vld [vmem:[#allocation29_spill] sm:$0xff]  ;;  %v3260_v8 = vld [vmem:[#allocation19_spill] sm:$0xff]  ;;  %v3261_v17 = vld [vmem:[#allocation16_spill] sm:$0xff] }
 0x235   : > { %v765_v16 = vsel %vm760_vm5, %v3255_v53, %v747_v32  ;;  %v2965_v26 = vpop.permute.xlu1 %1107  ;;  %v2969_v27 = vadd.f32 %v1065_v9, %v1034_v14  ;;  %v1059_v23 = vmul.f32 %v3259_v63, %v3258_v61  ;;  %v1063_v44 = vmul.f32 %v3259_v63, %v955_v48  ;;  %v3262_v41 = vld [vmem:[#allocation21_spill] sm:$0xff]  ;;  %v3265_v31 = vld [vmem:[#allocation24_spill] sm:$0xff] }
 0x236   : > { %v817_v21 = vmul.f32 %v2822_v20, %v765_v16  ;;  %v1066_v54 = vmul.f32 %v2790_v40, %v957_v0  ;;  %v763_v6 = vsel %vm760_vm5, %v747_v32, %v3256_v24  ;;  %v1032_v60 = vadd.f32 %v2802_v50, %v993_v28 }
 0x237   : > { %v1035_v25 = vadd.f32 %v2805_v52, %v996_v13  ;;  %v930_v35 = vsel %vm760_vm5, %v3261_v17, %v3260_v8  ;;  %v932_v20 = vsel %vm760_vm5, %v3262_v41, %v3261_v17  ;;  %v819_v48 = vmul.f32 %v2840_v46, %v761_v55  ;;  %v3264_v55 = vld [vmem:[#allocation22_spill] sm:$0xff] }
 0x238   : > { %v863_v9 = vadd.f32 %v2758_v38, %v816_v39  ;;  %v774_v53 = vpop.permute.xlu0 %773  ;;  %v2999_v7 = vadd.f32 %v1063_v44, %v1032_v60  ;;  %v818_v0 = vmul.f32 %v2825_v10, %v763_v6  ;;  %v864_v46 = vadd.f32 %v2784_v49, %v817_v21  ;;  %v3263_v39 = vld [vmem:[#allocation20_spill] sm:$0xff]  ;;  %v3266_v10 = vld [vmem:[#allocation25_spill] sm:$0xff] }
 0x239   : > { %v788_v50 = vsel %vm785_vm4, %v774_v53, %v2781_v30  ;;  %v790_v52 = vsel %vm785_vm4, %v2767_v12, %v774_v53  ;;  %v1100_v47 = vpop.permute.xlu1 %1099  ;;  %v3001_v14 = vadd.f32 %v1066_v54, %v1035_v25  ;;  %v982_v13 = vmul.f32 %v2720_v3, %v930_v35 }
 0x23a   : > { %v894_v38 = vmul.f32 %v2810_v42, %v790_v52  ;;  %v895_v28 = vmul.f32 %v2813_v2, %v788_v50  ;;  %v983_v32 = vmul.f32 %v2723_v51, %v3263_v39  ;;  %v981_v24 = vmul.f32 %v2726_v34, %v932_v20  ;;  %v3267_v2 = vld [vmem:[#allocation27_spill] sm:$0xff]  ;;  %v3268_v51 = vld [vmem:[#allocation26_spill] sm:$0xff] }
 0x23b   : > { %v984_v16 = vmul.f32 %v2734_v33, %v3264_v55  ;;  %v1061_v61 = vmul.f32 %v2737_v15, %v3265_v31  ;;  %v1062_v49 = vmul.f32 %v2790_v40, %v3266_v10  ;;  %v1093_v3 = vsel %vm760_vm5, %v2919_v18, %v3267_v2  ;;  %v3272_v10 = vld [vmem:[#allocation47_spill] sm:$0xff] }
 0x23c   : > { %v902_v63 = vadd.f32 %v894_v38, %v863_v9  ;;  %v903_v42 = vadd.f32 %v895_v28, %v864_v46  ;;  %v1104_v44 = vpop.permute.xlu0 %1103  ;;  %v1095_v34 = vsel %vm760_vm5, %v3268_v51, %v2919_v18  ;;  %v1091_v33 = vsel %vm760_vm5, %v3267_v2, %v1088_v58  ;;  %v3270_v38 = vld [vmem:[#allocation44_spill] sm:$0xff] }
 0x23d   : > { %v1097_v15 = vsel %vm760_vm5, %v1088_v58, %v3268_v51  ;;  %v782_v40 = vpop.permute.xlu1 %781  ;;  %v866_v21 = vadd.f32 %v2779_v29, %v819_v48  ;;  %v865_v54 = vadd.f32 %v2761_v57, %v818_v0  ;;  %v1117_v25 = vsel %vm785_vm4, %v1104_v44, %v2965_v26  ;;  %v3269_v29 = vld [vmem:[#allocation32_spill] sm:$0xff] }
 0x23e   : > { %v989_v6 = vadd.f32 %v981_v24, %v902_v63  ;;  %v990_v60 = vadd.f32 %v982_v13, %v903_v42  ;;  %v1119_v18 = vsel %vm785_vm4, %v1100_v47, %v1104_v44  ;;  %v786_v8 = vsel %vm785_vm4, %v2781_v30, %v782_v40  ;;  %v3273_v44 = vld [vmem:[#allocation43_spill] sm:$0xff] }
 0x23f   : > { %v792_v58 = vsel %vm785_vm4, %v782_v40, %v2767_v12  ;;  %v896_v35 = vmul.f32 %v2828_v43, %v786_v8  ;;  %v1147_v48 = vmul.f32 %v2843_v5, %v1095_v34  ;;  %v1148_v9 = vmul.f32 %v2846_v11, %v1093_v3  ;;  %v3274_v3 = vld [vmem:[#allocation34_spill] sm:$0xff] }
 0x240   : > { %v1028_v17 = vadd.f32 %v3269_v29, %v989_v6  ;;  %v1029_v57 = vadd.f32 %v2740_v62, %v990_v60  ;;  %v897_v41 = vmul.f32 %v2831_v45, %v792_v58  ;;  %v1086_v20 = vpop.permute.xlu0 %1085  ;;  %v1146_v53 = vmul.f32 %v2849_v19, %v1097_v15 }
 0x241   : > { %v1149_v30 = vmul.f32 %v2852_v36, %v1091_v33  ;;  %v1112_v50 = vpop.permute.xlu1 %1111  ;;  %v904_v0 = vadd.f32 %v896_v35, %v865_v54  ;;  %v1224_v62 = vmul.f32 %v2855_v37, %v1119_v18  ;;  %v1225_v43 = vmul.f32 %v3270_v38, %v1117_v25  ;;  %v3276_v33 = vld [vmem:[#allocation33_spill] sm:$0xff] }
 0x242   : > { %v1067_v52 = vadd.f32 %v1059_v23, %v1028_v17  ;;  %v1068_v12 = vadd.f32 %v1060_v1, %v1029_v57  ;;  %v905_v46 = vadd.f32 %v897_v41, %v866_v21  ;;  %v1115_v45 = vsel %vm785_vm4, %v2965_v26, %v1112_v50  ;;  %v3271_v23 = vld [vmem:[#allocation46_spill] sm:$0xff]  ;;  %v3278_v35 = vld [vmem:[#allocation45_spill] sm:$0xff] }
 0x243   : > { %v1121_v28 = vsel %vm785_vm4, %v1112_v50, %v1100_v47  ;;  %v991_v24 = vadd.f32 %v983_v32, %v904_v0  ;;  %v1226_v1 = vmul.f32 %v3271_v23, %v1115_v45  ;;  %v3275_v47 = vld [vmem:[#allocation37_spill] sm:$0xff]  ;;  %v3284_v45 = vld [vmem:[#allocation39_spill] sm:$0xff] }
 0x244   : > { %v1154_v13 = vadd.f32 %v1146_v53, %v1067_v52  ;;  %v1155_v39 = vadd.f32 %v1147_v48, %v1068_v12  ;;  %v992_v55 = vadd.f32 %v984_v16, %v905_v46  ;;  %v1090_v31 = vpop.permute.xlu0 %1089  ;;  %v1227_v63 = vmul.f32 %v3272_v10, %v1121_v28  ;;  %v3277_v16 = vld [vmem:[#allocation40_spill] sm:$0xff]  ;;  %v3281_v12 = vld [vmem:[#allocation38_spill] sm:$0xff] }
 0x245   : > { %v1092_v42 = vsel %vm760_vm5, %v1086_v20, %v1090_v31  ;;  %v1098_v2 = vsel %vm760_vm5, %v1090_v31, %v3273_v44  ;;  %v1082_v26 = vpop.permute.xlu1 %1081  ;;  %v1030_v32 = vadd.f32 %v3276_v33, %v991_v24 }
 0x246   : > { %v1193_v51 = vadd.f32 %v3274_v3, %v1154_v13  ;;  %v1194_v34 = vadd.f32 %v3275_v47, %v1155_v39  ;;  %v1031_v15 = vadd.f32 %v3277_v16, %v992_v55  ;;  %v1150_v40 = vmul.f32 %v2849_v19, %v1098_v2 }
 0x247   : > { %v1153_v21 = vmul.f32 %v2852_v36, %v1092_v42  ;;  %v1094_v54 = vsel %vm760_vm5, %v1082_v26, %v1086_v20  ;;  %v1096_v6 = vsel %vm760_vm5, %v3273_v44, %v1082_v26  ;;  %v1069_v18 = vadd.f32 %v1061_v61, %v1030_v32 }
 0x248   : > { %v1232_v60 = vadd.f32 %v1224_v62, %v1193_v51  ;;  %v1233_v25 = vadd.f32 %v1225_v43, %v1194_v34  ;;  %v1070_v8 = vadd.f32 %v1062_v49, %v1031_v15  ;;  %v1106_v58 = vpop.permute.xlu0 %1105  ;;  %v1158_v29 = vadd.f32 %v1150_v40, %v2999_v7  ;;  %v3283_v62 = vld [vmem:[#allocation42_spill] sm:$0xff] }
 0x249   : > { %v1161_v17 = vadd.f32 %v1153_v21, %v3001_v14  ;;  %v1151_v19 = vmul.f32 %v2843_v5, %v1096_v6  ;;  %v1152_v36 = vmul.f32 %v2846_v11, %v1094_v54  ;;  %v1110_v57 = vpop.permute.xlu1 %1109  ;;  %v1156_v20 = vadd.f32 %v1148_v9, %v1069_v18  ;;  %v3279_v14 = vld [vmem:[#allocation36_spill] sm:$0xff]  ;;  %v3280_v11 = vld [vmem:[#allocation35_spill] sm:$0xff]  ;;  %v3282_v9 = vld [vmem:[#allocation41_spill] sm:$0xff] }
 0x24a   : > { %v3082_v41 = vadd.f32 %v3278_v35, %v1232_v60  ;;  %v1157_v48 = vadd.f32 %v1149_v30, %v1070_v8  ;;  %v1118_v53 = vsel %vm785_vm4, %v1106_v58, %v1110_v57  ;;  %v1197_v50 = vadd.f32 %v3279_v14, %v1158_v29 }
 0x24b   : > { %v1159_v61 = vadd.f32 %v1151_v19, %v2967_v59  ;;  %v1160_v49 = vadd.f32 %v1152_v36, %v2969_v27  ;;  %v1229_v7 = vmul.f32 %v3270_v38, %v1118_v53  ;;  %v1195_v52 = vadd.f32 %v3280_v11, %v1156_v20  ;;  %v3285_v38 = vld [vmem:[#allocation48_spill] sm:$0xff] }
 0x24c   : > { %v1701_v5 = vmul.f32 -1.442695, %v3082_v41  ;;  %v1196_v0 = vadd.f32 %v3281_v12, %v1157_v48  ;;  %v1102_v46 = vpop.permute.xlu0 %1101  ;;  %v1200_v30 = vadd.f32 %v3282_v9, %v1161_v17  ;;  %v1263_v13 = vadd.f32 %v3285_v38, %v1233_v25 }
 0x24d   : > { %v1198_v43 = vadd.f32 %v3283_v62, %v1159_v61  ;;  %v1120_v59 = vsel %vm785_vm4, %v1102_v46, %v1106_v58  ;;  %v1199_v27 = vadd.f32 %v3284_v45, %v1160_v49  ;;  %v1114_v28 = vpop.permute.xlu1 %1113  ;;  %v1234_v39 = vadd.f32 %v1226_v1, %v1195_v52  ;;  %v1709_v45 = vld [vmem:[%s3175_s6] ss:$0 sm:$0xff] }
 0x24e   : > { %1921 = vpow2.f32 %v1701_v5  ;;  %v1235_v24 = vadd.f32 %v1227_v63, %v1196_v0  ;;  %v1228_v55 = vmul.f32 %v2855_v37, %v1120_v59  ;;  %v1116_v42 = vsel %vm785_vm4, %v1110_v57, %v1114_v28 }
 0x24f   : > { %v1237_v31 = vadd.f32 %v1229_v7, %v1198_v43  ;;  %v1122_v44 = vsel %vm785_vm4, %v1114_v28, %v1102_v46  ;;  %v1702_v2 = vmul.f32 -1.442695, %v1263_v13  ;;  %v1264_v26 = vadd.f32 %v2938_v22, %v1234_v39 }
 0x250   : > { %v1236_v3 = vadd.f32 %v1228_v55, %v1197_v50  ;;  %v1230_v51 = vmul.f32 %v3271_v23, %v1116_v42  ;;  %v1231_v47 = vmul.f32 %v3272_v10, %v1122_v44  ;;  %v1265_v37 = vadd.f32 %v2941_v4, %v1235_v24 }
 0x251   : > { %1923 = vpow2.f32 %v1702_v2  ;;  %v1267_v1 = vadd.f32 %v3285_v38, %v1237_v31  ;;  %v1703_v63 = vmul.f32 -1.442695, %v1264_v26 }
 0x252   : > { %v1238_v34 = vadd.f32 %v1230_v51, %v1199_v27  ;;  %v1239_v33 = vadd.f32 %v1231_v47, %v1200_v30  ;;  %v1266_v32 = vadd.f32 %v3278_v35, %v1236_v3  ;;  %v1704_v16 = vmul.f32 -1.442695, %v1265_v37 }
 0x253   : > { %v1706_v56 = vmul.f32 -1.442695, %v1267_v1  ;;  %1925 = vpow2.f32 %v1703_v63 }
 0x254   : > { %v1705_v15 = vmul.f32 -1.442695, %v1266_v32  ;;  %v1269_v40 = vadd.f32 %v2941_v4, %v1239_v33  ;;  %v1268_v23 = vadd.f32 %v2938_v22, %v1238_v34 }
 0x255   : > { %1927 = vpow2.f32 %v1706_v56 }
 0x256   : > { %1929 = vpow2.f32 %v1704_v16  ;;  %v1708_v10 = vmul.f32 -1.442695, %v1269_v40  ;;  %v1707_v21 = vmul.f32 -1.442695, %v1268_v23 }
 0x257   : > { %1931 = vpow2.f32 %v1705_v15 }
 0x258   : > { %1933 = vpow2.f32 %v1708_v10 }
 0x259   : > { %1935 = vpow2.f32 %v1707_v21 }
 0x25b   : > { %v1922_v54 = vpop.eup %1921 }
 0x25c   : > { %v1294_v6 = vadd.f32 1.0, %v1922_v54 }
 0x25e   : > { %v1924_v60 = vpop.eup %1923  ;;  %1937 = vrcp.f32 %v1294_v6 }
 0x25f   : > { %v1295_v25 = vadd.f32 1.0, %v1924_v60 }
 0x260   : > { %v1926_v18 = vpop.eup %1925 }
 0x261   : > { %1939 = vrcp.f32 %v1295_v25  ;;  %v1296_v58 = vadd.f32 1.0, %v1926_v18 }
 0x262   : > { %v1928_v8 = vpop.eup %1927 }
 0x263   : > { %v1930_v29 = vpop.eup %1929  ;;  %v1299_v4 = vadd.f32 1.0, %v1928_v8  ;;  %1941 = vrcp.f32 %v1296_v58 }
 0x264   : > { %v1932_v17 = vpop.eup %1931  ;;  %v1297_v22 = vadd.f32 1.0, %v1930_v29 }
 0x265   : > { %v1934_v19 = vpop.eup %1933  ;;  %1943 = vrcp.f32 %v1299_v4  ;;  %v1298_v36 = vadd.f32 1.0, %v1932_v17 }
 0x266   : > { %v1936_v57 = vpop.eup %1935  ;;  %1945 = vrcp.f32 %v1297_v22  ;;  %v1301_v35 = vadd.f32 1.0, %v1934_v19 }
 0x267   : > { %1947 = vrcp.f32 %v1298_v36  ;;  %v1300_v20 = vadd.f32 1.0, %v1936_v57 }
 0x268   : > { %1949 = vrcp.f32 %v1301_v35 }
 0x269   : > { %1951 = vrcp.f32 %v1300_v20 }
 0x26b   : > { %v1938_v48 = vpop.eup %1937 }
 0x26c   : > { %v1318_v61 = vmul.f32 %v1938_v48, %v3082_v41 }
 0x26e   : > { %v1940_v53 = vpop.eup %1939 }
 0x26f   : > { %v1319_v49 = vmul.f32 %v1940_v53, %v1263_v13 }
 0x270   : > { %v1942_v7 = vpop.eup %1941 }
 0x271   : > { %1461 = vmatprep.mubr.f32.mxu0 %v1319_v49  ;;  %v1320_v5 = vmul.f32 %v1942_v7, %v1264_v26  ;;  %v1953_v26 = vld [vmem:[%s2371_s22] sm:$0xff] }
 0x272   : > { %v1944_v14 = vpop.eup %1943  ;;  %1462 = vmatmul.mubr.f32.vlgmr.msra.gmra.mxu0 %v1318_v61 }
 0x273   : > { %v1946_v50 = vpop.eup %1945  ;;  %v1323_v11 = vmul.f32 %v1944_v14, %v1267_v1  ;;  %v1954_v1 = vld [vmem:[%s2371_s22 + $0x8] sm:$0xff] }
 0x274   : > { %v1948_v52 = vpop.eup %1947  ;;  %v1321_v12 = vmul.f32 %v1946_v50, %v1265_v37 }
 0x275   : > { %v1950_v0 = vpop.eup %1949  ;;  %1466 = vmatprep.mubr.f32.mxu0 %v1323_v11  ;;  %v1322_v46 = vmul.f32 %v1948_v52, %v1266_v32 }
 0x276   : > { %v1952_v9 = vpop.eup %1951  ;;  %1536 = vmatprep.mubr.f32.mxu1 %v1321_v12  ;;  %v1325_v30 = vmul.f32 %v1950_v0, %v1269_v40 }
 0x277   : > { %1537 = vmatmul.mubr.f32.vlgmr.msra.gmra.mxu1 %v1320_v5  ;;  %1467 = vmatmul.mubr.f32.gmra.mxu0 %v1322_v46  ;;  %v1324_v62 = vmul.f32 %v1952_v9, %v1268_v23 }
 0x278   : > { %1541 = vmatprep.mubr.f32.mxu1 %v1325_v30 }
 0x27b   : > { %1542 = vmatmul.mubr.f32.gmra.mxu1 %v1324_v62 }
 0x332   : > { %v1749_v41 = vpop.f32.mrf.mxu0 }
 0x334   : > { %v1750_v43 = vpop.f32.mrf.mxu0 }
 0x335   : > { %v1751_v59 = vadd.f32 %v1750_v43, %v1749_v41 }
 0x337   : > { %v1787_v27 = vpop.f32.mrf.mxu1  ;;  %v1752_v28 = vpop.f32.mrf.mxu0  ;;  %v1464_v39 = vadd.f32 %v1751_v59, %v1709_v45 }
 0x339   : > { %v1788_v38 = vpop.f32.mrf.mxu1  ;;  %v1753_v13 = vpop.f32.mrf.mxu0 }
 0x33a   : > { %v1789_v24 = vadd.f32 %v1788_v38, %v1787_v27  ;;  %v1754_v55 = vadd.f32 %v1753_v13, %v1752_v28 }
 0x33b   : > { %v1790_v31 = vpop.f32.mrf.mxu1 }
 0x33c   : > { %v1539_v42 = vadd.f32 %v1789_v24, %v1464_v39  ;;  %v1469_v44 = vadd.f32 %v1754_v55, %v1709_v45 }
 0x33d   : > { %v1791_v2 = vpop.f32.mrf.mxu1 }
 0x33e   : > { %v1547_v3 = vadd.f32 %v1953_v26, %v1539_v42  ;;  %v1792_v51 = vadd.f32 %v1791_v2, %v1790_v31 }
 0x340   : > { %1549 = vst [vmem:[%s352_s19] sm:$0xff] %v1547_v3  ;;  %v1544_v47 = vadd.f32 %v1792_v51, %v1469_v44 }
 0x342   : > { %v1548_v37 = vadd.f32 %v1954_v1, %v1544_v47 }
 0x344   : > { %1550 = vst [vmem:[%s352_s19 + $0x8] sm:$0xff] %v1548_v37 }
 0x345   : > { %2100 = shalt.err (!%p2097_p10)
}
 0x346   : > { %s2101_s22 = scalar_lea.hbm %s3125_s11, 256  ;;  %s2105_s15 = scalar_lea.hbm %s3176_s7, 512 }
 0x347   : > { %p2102_p3 = scmp.ne.s32.totalorder %s3125_s11, %s2101_s22  ;;  %p2106_p11 = scmp.lt.s32.totalorder %s3125_s11, %s3176_s7 }
 0x348   : > { %p2107_p4 = scmp.lt.s32.totalorder %s2105_s15, %s2101_s22 }
 0x349   : > { %p2103_p8 = pnand %p2102_p3, %p3286_p1 }
 0x34a   : > { %p2108_p7 = por %p2107_p4, %p2106_p11 }
 0x34b   : > { %p2104_p6 = pneg %p2103_p8 }
 0x34d   : > { %p2109_p12 = pnand %p2108_p7, %p2104_p6 }
 0x34f   : > { %2112 = shalt.err (!%p2109_p12)
}
 0x350   : > { %s2174_s18 = smov 128   ;;  %s2175_s14 = smov 8  }
 0x351   : > { %1811 = dma.vmem_to_hbm [thread:$0]  (%p3286_p1), %s3120_s10, 256, %s3125_s11, %s1552_s1, %s2174_s18, %s2174_s18, %s2175_s14  }
 0x352 PF: > { %s1580_s30 = sand.u32 1, %s2147_s24   ;;  %p3287_p9 = scmp.ne.s32.totalorder %s3201_s8, 0 }
 0x353   : > { %p3288_p13 = scmp.ge.s32.totalorder %s2159_s27, 2  ;;  %s1581_s28 = scalar_lea.sflag [#allocation4], %s1580_s30 }
 0x355   : > { %p1831_p2 = pnand %p3288_p13, %p3287_p9 }
 0x357   : > { %p1832_p0 = pneg %p1831_p2 }
 0x359   : > { %2142 = dma.done.wait (%p1832_p0), %s1581_s28, 256  }
 0x35a   : > { %2144 = vsyncadd (%p1832_p0), %s1581_s28, 4294967040  ;;  %p22_p5 = scmp.ge.s32.totalorder %s2307_s21, 4   ;;  %s3289_s24 = smov %s2151_s25 }
 0x35b   : > { %s3290_s25 = smov %s2155_s26  ;;  %s3291_s26 = smov %s2316_s29 }
 0x35c   : > { %s3292_s27 = smov %s2307_s21  ;;  %24 = sbr.rel (!%p22_p5) target bundleno = 9 (0x9), region = 117 }
 0x361   :  { %1586 = vsyncpa [#allocation3], 1 }
 0x362   :  { %1588 = vsyncpa [#allocation3 + $0x1], 1 }
 0x363   :  { %1589 = vsyncpa [#allocation6], 1 }
 0x364   :  { %1590 = vsyncpa [#allocation9], 1 }
 0x365   :  { %1591 = vsyncpa [#allocation4], 1 }
 0x366   :  { %1593 = vsyncpa [#allocation4 + $0x1], 1 }

</bundles_post_ra>
